<compile_context>
chip_gen: v7x
topology: tpu7x:2x2x1
jax: 0.10.0
libtpu: 0.0.40
codegen_flags: <defaults>
</compile_context>

<pallas_src>
import functools

import jax
import jax.numpy as jnp
from jax.experimental import pallas as pl
from jax.experimental.pallas import tpu as pltpu

KSIZE = 5
PAD = (KSIZE - 1) // 2           # 2
INV_SQRT2 = 0.7071067811865476
GELU_TANH_C = 0.7978845608028654  # sqrt(2/pi)


def _dwconv_gelu_kernel(x_ref, top_ref, bot_ref, w_ref, b_ref, o_ref,
                        xpad_ref, xsh_ref, *, g, rc, approx_gelu):
    """Depthwise 5x5 conv + bias + GELU on one (batch, row-strip) tile.

    Packed layout: the last dim packs `g` consecutive width positions with the
    C channels -> Lp = g*C lanes (lane-dense when g*C == 128).

    x_ref   : (1, TH, Wg, Lp)          current row strip (unpadded)
    top_ref : (1, PAD, Wg, Lp)         rows just above the strip
    bot_ref : (1, PAD, Wg, Lp)         rows just below the strip
    w_ref   : (25, Lp) f32             per-channel taps, tiled g times on lanes
    b_ref   : (1, Lp)  f32             bias, tiled g times on lanes
    o_ref   : (1, TH, Wg, Lp)          output strip
    xpad_ref: (TH+4, Wg+2*gpad, Lp) f32   zero-padded strip (scratch)
    xsh_ref : (5, TH+4, Wg, Lp) f32       width-shifted strips (scratch)
    """
    TH, Wg, Lp = o_ref.shape[1], o_ref.shape[2], o_ref.shape[3]
    C = Lp // g
    gpad = (xpad_ref.shape[1] - Wg) // 2
    rows = TH + 2 * PAD
    f32 = jnp.float32

    i = pl.program_id(1)
    n_strips = pl.num_programs(1)

    # ---- 1) assemble the zero-padded strip in f32 (single upcast here) ----
    zcol = jnp.zeros((rows, gpad, Lp), f32)
    xpad_ref[:, 0:gpad, :] = zcol                                   # left  pad
    xpad_ref[:, gpad + Wg:gpad + 2 * gpad + Wg, :] = zcol           # right pad
    xpad_ref[PAD:PAD + TH, gpad:gpad + Wg, :] = x_ref[0].astype(f32)

    @pl.when(i > 0)
    def _():
        xpad_ref[0:PAD, gpad:gpad + Wg, :] = top_ref[0].astype(f32)

    @pl.when(i == 0)
    def _():
        xpad_ref[0:PAD, gpad:gpad + Wg, :] = jnp.zeros((PAD, Wg, Lp), f32)

    @pl.when(i < n_strips - 1)
    def _():
        xpad_ref[PAD + TH:PAD + TH + PAD, gpad:gpad + Wg, :] = (
            bot_ref[0].astype(f32))

    @pl.when(i == n_strips - 1)
    def _():
        xpad_ref[PAD + TH:PAD + TH + PAD, gpad:gpad + Wg, :] = (
            jnp.zeros((PAD, Wg, Lp), f32))

    # ---- 2) pre-build the 5 width-shifted strips once per grid step --------
    # Lane realignment goes through XLU rolls (idle unit) + one select; no
    # double-width concat temporaries.
    lane = jax.lax.broadcasted_iota(jnp.int32, (rows * Wg, Lp), 1)
    for kw in range(KSIZE):
        d = kw - PAD                       # width offset in [-PAD, PAD]
        o0, msub = divmod(d, g)            # packed-group offset + slot shift
        mlane = msub * C                   # lane shift inside a 128-lane group
        g0 = gpad + o0
        if mlane == 0:
            xsh_ref[kw] = xpad_ref[:, g0:g0 + Wg, :]
        else:
            a_lo = xpad_ref[:, g0:g0 + Wg, :].reshape(rows * Wg, Lp)
            a_hi = xpad_ref[:, g0 + 1:g0 + 1 + Wg, :].reshape(rows * Wg, Lp)
            rl = pltpu.roll(a_lo, Lp - mlane, 1)
            rh = pltpu.roll(a_hi, Lp - mlane, 1)
            xsh_ref[kw] = jnp.where(lane < Lp - mlane, rl, rh).reshape(
                rows, Wg, Lp)

    # ---- 3) weights / bias: loaded & shaped once (hoisted from MAC loops) --
    w_taps = [w_ref[t:t + 1, :].reshape(1, 1, Lp)
              for t in range(KSIZE * KSIZE)]
    bias_b = b_ref[0:1, :].reshape(1, 1, Lp)

    def gelu(a):
        if approx_gelu:
            # tanh approximation -> EUP (separate VLIW slot on v6e/v7x).
            return 0.5 * a * (1.0 + jnp.tanh(
                GELU_TANH_C * (a + 0.044715 * (a * a * a))))
        # Exact erf GELU: bit-parity with torch.nn.GELU() default.
        return 0.5 * a * (1.0 + jax.lax.erf(a * INV_SQRT2))

    # ---- 4) row-chunked 25-tap MAC: acc stays register-resident ------------
    def do_chunk(r0):
        acc = jnp.broadcast_to(bias_b, (rc, Wg, Lp))        # bias-initialised
        for kw in range(KSIZE):
            win = xsh_ref[kw, pl.ds(r0, rc + 2 * PAD)]      # (rc+4, Wg, Lp)
            for kh in range(KSIZE):
                acc = acc + win[kh:kh + rc] * w_taps[kh * KSIZE + kw]
        o_ref[0, pl.ds(r0, rc)] = gelu(acc).astype(o_ref.dtype)

    n_chunks = TH // rc
    if n_chunks <= 8:
        for c in range(n_chunks):          # fully unrolled: LLO visibility
            do_chunk(c * rc)
    else:
        @pl.loop(0, n_chunks)
        def _(c):
            r0 = c * rc
            if rc > 1:
                r0 = pl.multiple_of(r0, rc)
            do_chunk(r0)


def _pick_g(C, W):
    """Lane-packing factor: prefer Lp=g*C==128 and Wg=W//g a multiple of 8."""
    gmax = max(1, min(128 // C if C > 0 else 1, W))
    best, best_key = 1, None
    for cand in range(1, gmax + 1):
        if W % cand:
            continue
        Lp, Wg = cand * C, W // cand
        key = (Lp == 128, Wg % 8 == 0, cand)
        if best_key is None or key > best_key:
            best, best_key = cand, key
    return best


def _pick_tile_rows(batch, H, Wg, Lp, gpad, itemsize, budget_bytes):
    """Largest even divisor of H whose per-step working set fits the budget,
    then reduced (not below 8 rows) so B*n_strips can feed 2 TCs on v7x."""
    def step_bytes(th):
        rows = th + 2 * PAD
        xblk = th * Wg * Lp * itemsize
        halo = 2 * PAD * Wg * Lp * itemsize
        oblk = th * Wg * Lp * itemsize
        params = (KSIZE * KSIZE + 1) * Lp * 4
        pipelined = 2 * (xblk + halo + oblk + params)   # double-buffered DMAs
        xpad = rows * (Wg + 2 * gpad) * Lp * 4
        xsh = KSIZE * rows * Wg * Lp * 4
        temps = 3 * rows * Wg * Lp * 4                  # shift-build temporaries
        return pipelined + xpad + xsh + temps

    cands = [t for t in range(2, H + 1, 2) if H % t == 0]
    if not cands:
        cands = [H]                                     # odd H -> single strip
    fitting = [t for t in cands if step_bytes(t) <= budget_bytes]
    th = max(fitting) if fitting else min(cands)

    MIN_STEPS = 8                                       # ~4 steps per v7x TC
    if batch * (H // th) < MIN_STEPS:
        smaller = [t for t in cands
                   if t <= th and t >= 8 and batch * (H // t) >= MIN_STEPS]
        if smaller:
            th = max(smaller)
    return th


def dwconv_forward(x, x_size, weight, bias, *, approximate_gelu=False):
    """Pallas equivalent of dwconv.forward.

    x:      (B, L, C) with L = H*W
    x_size: (H, W)
    weight: (C, 1, 5, 5)   (PyTorch depthwise Conv2d weight layout)
    bias:   (C,)
    returns (B, L, C)
    """
    B, L, C = x.shape
    H, W = x_size
    assert L == H * W, (L, H, W)

    # ---- lane packing: fold g consecutive width positions into lanes -------
    g = _pick_g(C, W)
    Wg = W // g
    Lp = g * C
    gpad = -(-PAD // g)                    # ceil(PAD / g) zero-pad groups/side

    # ---- generation-aware VMEM budget & row-strip tile size ----------------
    try:
        vmem_cap = int(pltpu.get_tpu_info().vmem_capacity_bytes)
    except Exception:                      # pragma: no cover - defensive
        vmem_cap = 64 * 1024 * 1024        # v7x-per-core conservative fallback
    budget = max(8 << 20, min(vmem_cap // 2 - (4 << 20), 40 << 20))
    vmem_limit = int(max(24 << 20,
                         min(vmem_cap - (8 << 20), budget + (16 << 20))))

    TH = _pick_tile_rows(B, H, Wg, Lp, gpad, x.dtype.itemsize, budget)
    n_strips = H // TH
    RC = 4 if TH % 4 == 0 else (2 if TH % 2 == 0 else 1)

    # Free, contiguity-preserving reshapes only (no pad / transpose pass).
    x_packed = x.reshape(B, H, Wg, Lp)
    w_flat = jnp.transpose(
        weight[:, 0, :, :].reshape(C, KSIZE * KSIZE), (1, 0)).astype(jnp.float32)
    w_packed = jnp.tile(w_flat, (1, g))                            # (25, Lp)
    b_packed = jnp.tile(bias.reshape(1, C).astype(jnp.float32), (1, g))  # (1, Lp)

    hb = max(TH // PAD, 1)                 # halo stride in PAD-row blocks
    max_hblk = max((H - PAD) // PAD, 0)

    kernel = functools.partial(_dwconv_gelu_kernel, g=g, rc=RC,
                               approx_gelu=approximate_gelu)

    out_packed = pl.pallas_call(
        kernel,
        out_shape=jax.ShapeDtypeStruct((B, H, Wg, Lp), x.dtype),
        grid_spec=pltpu.PrefetchScalarGridSpec(
            num_scalar_prefetch=0,
            grid=(B, n_strips),
            in_specs=[
                # current strip
                pl.BlockSpec((1, TH, Wg, Lp), lambda b, i: (b, i, 0, 0)),
                # PAD rows directly above / below (clamped at image edges;
                # the kernel zero-fills them at the boundaries)
                pl.BlockSpec(
                    (1, PAD, Wg, Lp),
                    lambda b, i: (b, jnp.clip(i * hb - 1, 0, max_hblk), 0, 0)),
                pl.BlockSpec(
                    (1, PAD, Wg, Lp),
                    lambda b, i: (b, jnp.clip((i + 1) * hb, 0, max_hblk), 0, 0)),
                # weights / bias: constant index maps -> VMEM-resident
                pl.BlockSpec((KSIZE * KSIZE, Lp), lambda b, i: (0, 0)),
                pl.BlockSpec((1, Lp), lambda b, i: (0, 0)),
            ],
            out_specs=pl.BlockSpec((1, TH, Wg, Lp), lambda b, i: (b, i, 0, 0)),
            scratch_shapes=[
                pltpu.VMEM((TH + 2 * PAD, Wg + 2 * gpad, Lp), jnp.float32),
                pltpu.VMEM((KSIZE, TH + 2 * PAD, Wg, Lp), jnp.float32),
            ]),
        compiler_params=pltpu.CompilerParams(
            dimension_semantics=("parallel", "parallel"),
            vmem_limit_bytes=vmem_limit),
    )(x_packed, x_packed, x_packed, w_packed, b_packed)

    return out_packed.reshape(B, H * W, C)


def _reference(x, x_size, weight, bias, *, approximate=False):
    """Pure-JAX reference matching the PyTorch forward."""
    B, L, C = x.shape
    H, W = x_size
    img = jnp.transpose(x, (0, 2, 1)).reshape(B, C, H, W)            # NCHW
    y = jax.lax.conv_general_dilated(
        img, weight, window_strides=(1, 1), padding="SAME",
        feature_group_count=C)
    y = y + bias[None, :, None, None]
    y = jax.nn.gelu(y, approximate=approximate)
    return jnp.transpose(y.reshape(B, C, H * W), (0, 2, 1))


def _run_case(key, B, C, H, W, *, approximate_gelu=False, rtol=1e-5, atol=1e-5):
    kx, kw, kb = jax.random.split(key, 3)
    x = jax.random.normal(kx, (B, H * W, C), dtype=jnp.float32)
    fan_in = 1 * KSIZE * KSIZE
    bound = 1.0 / (fan_in ** 0.5)
    weight = jax.random.uniform(kw, (C, 1, KSIZE, KSIZE),
                                minval=-bound, maxval=bound, dtype=jnp.float32)
    bias = jax.random.uniform(kb, (C,), minval=-bound, maxval=bound,
                              dtype=jnp.float32)

    out = jax.block_until_ready(
        dwconv_forward(x, (H, W), weight, bias,
                       approximate_gelu=approximate_gelu))
    ref = _reference(x, (H, W), weight, bias, approximate=approximate_gelu)

    assert out.shape == (B, H * W, C)
    err = float(jnp.max(jnp.abs(out - ref)))
    assert jnp.allclose(out, ref, rtol=rtol, atol=atol), (B, C, H, W, err)
    return err


if __name__ == "__main__":
    key = jax.random.PRNGKey(0)
    k1, k2, k3 = jax.random.split(key, 3)

    # Main case: multi-strip halo path, lane-dense Lp=128, Wg % 8 == 0.
    _run_case(k1, B=2, C=32, H=32, W=32)

    # Odd H: single strip (both halos zeroed) + in-kernel pl.loop chunk path.
    _run_case(k2, B=1, C=32, H=33, W=16)

    # Approximate (tanh / EUP) GELU path vs. its matching JAX reference.
    _run_case(k3, B=2, C=32, H=32, W=32, approximate_gelu=True,
              rtol=0.0, atol=2e-2)

    print("KERNEL_OK")
</pallas_src>

<mosaic_0001>
module attributes {stable_mosaic.version = 11 : i64} {
  func.func @_dwconv_gelu_kernel(%arg0: i32, %arg1: i32, %arg2: memref<1x8x8x128xf32, #tpu.memory_space<vmem>>, %arg3: memref<1x2x8x128xf32, #tpu.memory_space<vmem>>, %arg4: memref<1x2x8x128xf32, #tpu.memory_space<vmem>>, %arg5: memref<25x128xf32, #tpu.memory_space<vmem>>, %arg6: memref<1x128xf32, #tpu.memory_space<vmem>>, %arg7: memref<1x8x8x128xf32, #tpu.memory_space<vmem>>, %arg8: memref<12x10x128xf32, #tpu.memory_space<vmem>>, %arg9: memref<5x12x8x128xf32, #tpu.memory_space<vmem>>) attributes {dimension_semantics = [#tpu.dimension_semantics<parallel>, #tpu.dimension_semantics<parallel>], iteration_bounds = array<i64: 2, 4>, scalar_prefetch = 0 : i64, scratch_operands = 2 : i64, tpu.core_type = #tpu.core_type<tc>, window_params = [{transform_indices = @transform_0, window_bounds = array<i64: 1, 8, 8, 128>}, {transform_indices = @transform_1, window_bounds = array<i64: 1, 2, 8, 128>}, {transform_indices = @transform_2, window_bounds = array<i64: 1, 2, 8, 128>}, {pipeline_mode = #tpu.pipeline_mode<synchronous>, transform_indices = @transform_3, window_bounds = array<i64: 25, 128>}, {pipeline_mode = #tpu.pipeline_mode<synchronous>, transform_indices = @transform_4, window_bounds = array<i64: 1, 128>}, {transform_indices = @transform_5, window_bounds = array<i64: 1, 8, 8, 128>}]} {
    %cst = arith.constant 0.000000e+00 : f32
    %0 = vector.broadcast %cst : f32 to vector<12x1x128xf32>
    %c0 = arith.constant 0 : index
    %c0_0 = arith.constant 0 : index
    %c0_1 = arith.constant 0 : index
    %1 = vector.load %arg8[%c0, %c0_0, %c0_1] : memref<12x10x128xf32, #tpu.memory_space<vmem>>, vector<12x1x128xf32>
    tpu.vector_store %arg8[%c0, %c0_0, %c0_1], %0 {strides = array<i32>} : memref<12x10x128xf32, #tpu.memory_space<vmem>>, vector<12x1x128xf32>,
    %c0_2 = arith.constant 0 : index
    %c9 = arith.constant 9 : index
    %c0_3 = arith.constant 0 : index
    %2 = vector.load %arg8[%c0_2, %c9, %c0_3] : memref<12x10x128xf32, #tpu.memory_space<vmem>>, vector<12x1x128xf32>
    tpu.vector_store %arg8[%c0_2, %c9, %c0_3], %0 {strides = array<i32>} : memref<12x10x128xf32, #tpu.memory_space<vmem>>, vector<12x1x128xf32>,
    %c0_4 = arith.constant 0 : index
    %c0_5 = arith.constant 0 : index
    %c0_6 = arith.constant 0 : index
    %c0_7 = arith.constant 0 : index
    %3 = vector.load %arg2[%c0_4, %c0_5, %c0_6, %c0_7] : memref<1x8x8x128xf32, #tpu.memory_space<vmem>>, vector<1x8x8x128xf32>
    %4 = vector.shape_cast %3 : vector<1x8x8x128xf32> to vector<8x8x128xf32>
    %c2 = arith.constant 2 : index
    %c1 = arith.constant 1 : index
    %c0_8 = arith.constant 0 : index
    %5 = vector.load %arg8[%c2, %c1, %c0_8] : memref<12x10x128xf32, #tpu.memory_space<vmem>>, vector<8x8x128xf32>
    tpu.vector_store %arg8[%c2, %c1, %c0_8], %4 {strides = array<i32>} : memref<12x10x128xf32, #tpu.memory_space<vmem>>, vector<8x8x128xf32>,
    %c0_i32 = arith.constant 0 : i32
    %6 = arith.cmpi sgt, %arg1, %c0_i32 : i32
    %7 = arith.extui %6 : i1 to i32
    %c0_i32_9 = arith.constant 0 : i32
    %8 = arith.cmpi ne, %7, %c0_i32_9 : i32
    scf.if %8 {
      %c0_156 = arith.constant 0 : index
      %c0_157 = arith.constant 0 : index
      %c0_158 = arith.constant 0 : index
      %c0_159 = arith.constant 0 : index
      %373 = vector.load %arg3[%c0_156, %c0_157, %c0_158, %c0_159] : memref<1x2x8x128xf32, #tpu.memory_space<vmem>>, vector<1x2x8x128xf32>
      %374 = vector.shape_cast %373 : vector<1x2x8x128xf32> to vector<2x8x128xf32>
      %c0_160 = arith.constant 0 : index
      %c1_161 = arith.constant 1 : index
      %c0_162 = arith.constant 0 : index
      %375 = vector.load %arg8[%c0_160, %c1_161, %c0_162] : memref<12x10x128xf32, #tpu.memory_space<vmem>>, vector<2x8x128xf32>
      tpu.vector_store %arg8[%c0_160, %c1_161, %c0_162], %374 {strides = array<i32>} : memref<12x10x128xf32, #tpu.memory_space<vmem>>, vector<2x8x128xf32>,
    } else {
    }
    %c0_i32_10 = arith.constant 0 : i32
    %9 = arith.cmpi eq, %arg1, %c0_i32_10 : i32
    %10 = arith.extui %9 : i1 to i32
    %c0_i32_11 = arith.constant 0 : i32
    %11 = arith.cmpi ne, %10, %c0_i32_11 : i32
    scf.if %11 {
      %cst_156 = arith.constant 0.000000e+00 : f32
      %373 = vector.broadcast %cst_156 : f32 to vector<2x8x128xf32>
      %c0_157 = arith.constant 0 : index
      %c1_158 = arith.constant 1 : index
      %c0_159 = arith.constant 0 : index
      %374 = vector.load %arg8[%c0_157, %c1_158, %c0_159] : memref<12x10x128xf32, #tpu.memory_space<vmem>>, vector<2x8x128xf32>
      tpu.vector_store %arg8[%c0_157, %c1_158, %c0_159], %373 {strides = array<i32>} : memref<12x10x128xf32, #tpu.memory_space<vmem>>, vector<2x8x128xf32>,
    } else {
    }
    %c3_i32 = arith.constant 3 : i32
    %12 = arith.cmpi slt, %arg1, %c3_i32 : i32
    %13 = arith.extui %12 : i1 to i32
    %c0_i32_12 = arith.constant 0 : i32
    %14 = arith.cmpi ne, %13, %c0_i32_12 : i32
    scf.if %14 {
      %c0_156 = arith.constant 0 : index
      %c0_157 = arith.constant 0 : index
      %c0_158 = arith.constant 0 : index
      %c0_159 = arith.constant 0 : index
      %373 = vector.load %arg4[%c0_156, %c0_157, %c0_158, %c0_159] : memref<1x2x8x128xf32, #tpu.memory_space<vmem>>, vector<1x2x8x128xf32>
      %374 = vector.shape_cast %373 : vector<1x2x8x128xf32> to vector<2x8x128xf32>
      %c10_160 = arith.constant 10 : index
      %c1_161 = arith.constant 1 : index
      %c0_162 = arith.constant 0 : index
      %375 = vector.load %arg8[%c10_160, %c1_161, %c0_162] : memref<12x10x128xf32, #tpu.memory_space<vmem>>, vector<2x8x128xf32>
      tpu.vector_store %arg8[%c10_160, %c1_161, %c0_162], %374 {strides = array<i32>} : memref<12x10x128xf32, #tpu.memory_space<vmem>>, vector<2x8x128xf32>,
    } else {
    }
    %c3_i32_13 = arith.constant 3 : i32
    %15 = arith.cmpi eq, %arg1, %c3_i32_13 : i32
    %16 = arith.extui %15 : i1 to i32
    %c0_i32_14 = arith.constant 0 : i32
    %17 = arith.cmpi ne, %16, %c0_i32_14 : i32
    scf.if %17 {
      %cst_156 = arith.constant 0.000000e+00 : f32
      %373 = vector.broadcast %cst_156 : f32 to vector<2x8x128xf32>
      %c10_157 = arith.constant 10 : index
      %c1_158 = arith.constant 1 : index
      %c0_159 = arith.constant 0 : index
      %374 = vector.load %arg8[%c10_157, %c1_158, %c0_159] : memref<12x10x128xf32, #tpu.memory_space<vmem>>, vector<2x8x128xf32>
      tpu.vector_store %arg8[%c10_157, %c1_158, %c0_159], %373 {strides = array<i32>} : memref<12x10x128xf32, #tpu.memory_space<vmem>>, vector<2x8x128xf32>,
    } else {
    }
    %18 = tpu.iota {dimensions = array<i32: 1>} : vector<96x128xi32>
    %c0_15 = arith.constant 0 : index
    %c0_16 = arith.constant 0 : index
    %c0_17 = arith.constant 0 : index
    %19 = vector.load %arg8[%c0_15, %c0_16, %c0_17] : memref<12x10x128xf32, #tpu.memory_space<vmem>>, vector<12x8x128xf32>
    %20 = vector.shape_cast %19 : vector<12x8x128xf32> to vector<96x128xf32>
    %c0_18 = arith.constant 0 : index
    %c1_19 = arith.constant 1 : index
    %c0_20 = arith.constant 0 : index
    %21 = vector.load %arg8[%c0_18, %c1_19, %c0_20] : memref<12x10x128xf32, #tpu.memory_space<vmem>>, vector<12x8x128xf32>
    %22 = vector.shape_cast %21 : vector<12x8x128xf32> to vector<96x128xf32>
    %c64_i32 = arith.constant 64 : i32
    %23 = tpu.dynamic_rotate %20 by %c64_i32 dim 1 : vector<96x128xf32>, i32 -> vector<96x128xf32>
    %c64_i32_21 = arith.constant 64 : i32
    %24 = tpu.dynamic_rotate %22 by %c64_i32_21 dim 1 : vector<96x128xf32>, i32 -> vector<96x128xf32>
    %c64_i32_22 = arith.constant 64 : i32
    %25 = vector.broadcast %c64_i32_22 : i32 to vector<96x128xi32>
    %26 = arith.cmpi slt, %18, %25 : vector<96x128xi32>
    %27 = arith.select %26, %23, %24 : vector<96x128xi1>, vector<96x128xf32>
    %28 = vector.shape_cast %27 : vector<96x128xf32> to vector<12x8x128xf32>
    %c0_23 = arith.constant 0 : index
    %c0_24 = arith.constant 0 : index
    %c0_25 = arith.constant 0 : index
    %c0_26 = arith.constant 0 : index
    %29 = vector.load %arg9[%c0_23, %c0_24, %c0_25, %c0_26] : memref<5x12x8x128xf32, #tpu.memory_space<vmem>>, vector<1x12x8x128xf32>
    %30 = vector.shape_cast %29 : vector<1x12x8x128xf32> to vector<12x8x128xf32>
    %31 = vector.shape_cast %28 : vector<12x8x128xf32> to vector<1x12x8x128xf32>
    tpu.vector_store %arg9[%c0_23, %c0_24, %c0_25, %c0_26], %31 {strides = array<i32>} : memref<5x12x8x128xf32, #tpu.memory_space<vmem>>, vector<1x12x8x128xf32>,
    %c0_27 = arith.constant 0 : index
    %c0_28 = arith.constant 0 : index
    %c0_29 = arith.constant 0 : index
    %32 = vector.load %arg8[%c0_27, %c0_28, %c0_29] : memref<12x10x128xf32, #tpu.memory_space<vmem>>, vector<12x8x128xf32>
    %33 = vector.shape_cast %32 : vector<12x8x128xf32> to vector<96x128xf32>
    %c0_30 = arith.constant 0 : index
    %c1_31 = arith.constant 1 : index
    %c0_32 = arith.constant 0 : index
    %34 = vector.load %arg8[%c0_30, %c1_31, %c0_32] : memref<12x10x128xf32, #tpu.memory_space<vmem>>, vector<12x8x128xf32>
    %35 = vector.shape_cast %34 : vector<12x8x128xf32> to vector<96x128xf32>
    %c32_i32 = arith.constant 32 : i32
    %36 = tpu.dynamic_rotate %33 by %c32_i32 dim 1 : vector<96x128xf32>, i32 -> vector<96x128xf32>
    %c32_i32_33 = arith.constant 32 : i32
    %37 = tpu.dynamic_rotate %35 by %c32_i32_33 dim 1 : vector<96x128xf32>, i32 -> vector<96x128xf32>
    %c32_i32_34 = arith.constant 32 : i32
    %38 = vector.broadcast %c32_i32_34 : i32 to vector<96x128xi32>
    %39 = arith.cmpi slt, %18, %38 : vector<96x128xi32>
    %40 = arith.select %39, %36, %37 : vector<96x128xi1>, vector<96x128xf32>
    %41 = vector.shape_cast %40 : vector<96x128xf32> to vector<12x8x128xf32>
    %c1_35 = arith.constant 1 : index
    %c0_36 = arith.constant 0 : index
    %c0_37 = arith.constant 0 : index
    %c0_38 = arith.constant 0 : index
    %42 = vector.load %arg9[%c1_35, %c0_36, %c0_37, %c0_38] : memref<5x12x8x128xf32, #tpu.memory_space<vmem>>, vector<1x12x8x128xf32>
    %43 = vector.shape_cast %42 : vector<1x12x8x128xf32> to vector<12x8x128xf32>
    %44 = vector.shape_cast %41 : vector<12x8x128xf32> to vector<1x12x8x128xf32>
    tpu.vector_store %arg9[%c1_35, %c0_36, %c0_37, %c0_38], %44 {strides = array<i32>} : memref<5x12x8x128xf32, #tpu.memory_space<vmem>>, vector<1x12x8x128xf32>,
    %c0_39 = arith.constant 0 : index
    %c1_40 = arith.constant 1 : index
    %c0_41 = arith.constant 0 : index
    %45 = vector.load %arg8[%c0_39, %c1_40, %c0_41] : memref<12x10x128xf32, #tpu.memory_space<vmem>>, vector<12x8x128xf32>
    %c2_42 = arith.constant 2 : index
    %c0_43 = arith.constant 0 : index
    %c0_44 = arith.constant 0 : index
    %c0_45 = arith.constant 0 : index
    %46 = vector.load %arg9[%c2_42, %c0_43, %c0_44, %c0_45] : memref<5x12x8x128xf32, #tpu.memory_space<vmem>>, vector<1x12x8x128xf32>
    %47 = vector.shape_cast %46 : vector<1x12x8x128xf32> to vector<12x8x128xf32>
    %48 = vector.shape_cast %45 : vector<12x8x128xf32> to vector<1x12x8x128xf32>
    tpu.vector_store %arg9[%c2_42, %c0_43, %c0_44, %c0_45], %48 {strides = array<i32>} : memref<5x12x8x128xf32, #tpu.memory_space<vmem>>, vector<1x12x8x128xf32>,
    %c0_46 = arith.constant 0 : index
    %c1_47 = arith.constant 1 : index
    %c0_48 = arith.constant 0 : index
    %49 = vector.load %arg8[%c0_46, %c1_47, %c0_48] : memref<12x10x128xf32, #tpu.memory_space<vmem>>, vector<12x8x128xf32>
    %50 = vector.shape_cast %49 : vector<12x8x128xf32> to vector<96x128xf32>
    %c0_49 = arith.constant 0 : index
    %c2_50 = arith.constant 2 : index
    %c0_51 = arith.constant 0 : index
    %51 = vector.load %arg8[%c0_49, %c2_50, %c0_51] : memref<12x10x128xf32, #tpu.memory_space<vmem>>, vector<12x8x128xf32>
    %52 = vector.shape_cast %51 : vector<12x8x128xf32> to vector<96x128xf32>
    %c96_i32 = arith.constant 96 : i32
    %53 = tpu.dynamic_rotate %50 by %c96_i32 dim 1 : vector<96x128xf32>, i32 -> vector<96x128xf32>
    %c96_i32_52 = arith.constant 96 : i32
    %54 = tpu.dynamic_rotate %52 by %c96_i32_52 dim 1 : vector<96x128xf32>, i32 -> vector<96x128xf32>
    %c96_i32_53 = arith.constant 96 : i32
    %55 = vector.broadcast %c96_i32_53 : i32 to vector<96x128xi32>
    %56 = arith.cmpi slt, %18, %55 : vector<96x128xi32>
    %57 = arith.select %56, %53, %54 : vector<96x128xi1>, vector<96x128xf32>
    %58 = vector.shape_cast %57 : vector<96x128xf32> to vector<12x8x128xf32>
    %c3 = arith.constant 3 : index
    %c0_54 = arith.constant 0 : index
    %c0_55 = arith.constant 0 : index
    %c0_56 = arith.constant 0 : index
    %59 = vector.load %arg9[%c3, %c0_54, %c0_55, %c0_56] : memref<5x12x8x128xf32, #tpu.memory_space<vmem>>, vector<1x12x8x128xf32>
    %60 = vector.shape_cast %59 : vector<1x12x8x128xf32> to vector<12x8x128xf32>
    %61 = vector.shape_cast %58 : vector<12x8x128xf32> to vector<1x12x8x128xf32>
    tpu.vector_store %arg9[%c3, %c0_54, %c0_55, %c0_56], %61 {strides = array<i32>} : memref<5x12x8x128xf32, #tpu.memory_space<vmem>>, vector<1x12x8x128xf32>,
    %c0_57 = arith.constant 0 : index
    %c1_58 = arith.constant 1 : index
    %c0_59 = arith.constant 0 : index
    %62 = vector.load %arg8[%c0_57, %c1_58, %c0_59] : memref<12x10x128xf32, #tpu.memory_space<vmem>>, vector<12x8x128xf32>
    %63 = vector.shape_cast %62 : vector<12x8x128xf32> to vector<96x128xf32>
    %c0_60 = arith.constant 0 : index
    %c2_61 = arith.constant 2 : index
    %c0_62 = arith.constant 0 : index
    %64 = vector.load %arg8[%c0_60, %c2_61, %c0_62] : memref<12x10x128xf32, #tpu.memory_space<vmem>>, vector<12x8x128xf32>
    %65 = vector.shape_cast %64 : vector<12x8x128xf32> to vector<96x128xf32>
    %c64_i32_63 = arith.constant 64 : i32
    %66 = tpu.dynamic_rotate %63 by %c64_i32_63 dim 1 : vector<96x128xf32>, i32 -> vector<96x128xf32>
    %c64_i32_64 = arith.constant 64 : i32
    %67 = tpu.dynamic_rotate %65 by %c64_i32_64 dim 1 : vector<96x128xf32>, i32 -> vector<96x128xf32>
    %c64_i32_65 = arith.constant 64 : i32
    %68 = vector.broadcast %c64_i32_65 : i32 to vector<96x128xi32>
    %69 = arith.cmpi slt, %18, %68 : vector<96x128xi32>
    %70 = arith.select %69, %66, %67 : vector<96x128xi1>, vector<96x128xf32>
    %71 = vector.shape_cast %70 : vector<96x128xf32> to vector<12x8x128xf32>
    %c4 = arith.constant 4 : index
    %c0_66 = arith.constant 0 : index
    %c0_67 = arith.constant 0 : index
    %c0_68 = arith.constant 0 : index
    %72 = vector.load %arg9[%c4, %c0_66, %c0_67, %c0_68] : memref<5x12x8x128xf32, #tpu.memory_space<vmem>>, vector<1x12x8x128xf32>
    %73 = vector.shape_cast %72 : vector<1x12x8x128xf32> to vector<12x8x128xf32>
    %74 = vector.shape_cast %71 : vector<12x8x128xf32> to vector<1x12x8x128xf32>
    tpu.vector_store %arg9[%c4, %c0_66, %c0_67, %c0_68], %74 {strides = array<i32>} : memref<5x12x8x128xf32, #tpu.memory_space<vmem>>, vector<1x12x8x128xf32>,
    %c0_69 = arith.constant 0 : index
    %c0_70 = arith.constant 0 : index
    %75 = vector.load %arg5[%c0_69, %c0_70] : memref<25x128xf32, #tpu.memory_space<vmem>>, vector<1x128xf32>
    %76 = vector.shape_cast %75 : vector<1x128xf32> to vector<1x1x128xf32>
    %c1_71 = arith.constant 1 : index
    %c0_72 = arith.constant 0 : index
    %77 = vector.load %arg5[%c1_71, %c0_72] : memref<25x128xf32, #tpu.memory_space<vmem>>, vector<1x128xf32>
    %78 = vector.shape_cast %77 : vector<1x128xf32> to vector<1x1x128xf32>
    %c2_73 = arith.constant 2 : index
    %c0_74 = arith.constant 0 : index
    %79 = vector.load %arg5[%c2_73, %c0_74] : memref<25x128xf32, #tpu.memory_space<vmem>>, vector<1x128xf32>
    %80 = vector.shape_cast %79 : vector<1x128xf32> to vector<1x1x128xf32>
    %c3_75 = arith.constant 3 : index
    %c0_76 = arith.constant 0 : index
    %81 = vector.load %arg5[%c3_75, %c0_76] : memref<25x128xf32, #tpu.memory_space<vmem>>, vector<1x128xf32>
    %82 = vector.shape_cast %81 : vector<1x128xf32> to vector<1x1x128xf32>
    %c4_77 = arith.constant 4 : index
    %c0_78 = arith.constant 0 : index
    %83 = vector.load %arg5[%c4_77, %c0_78] : memref<25x128xf32, #tpu.memory_space<vmem>>, vector<1x128xf32>
    %84 = vector.shape_cast %83 : vector<1x128xf32> to vector<1x1x128xf32>
    %c5 = arith.constant 5 : index
    %c0_79 = arith.constant 0 : index
    %85 = vector.load %arg5[%c5, %c0_79] : memref<25x128xf32, #tpu.memory_space<vmem>>, vector<1x128xf32>
    %86 = vector.shape_cast %85 : vector<1x128xf32> to vector<1x1x128xf32>
    %c6 = arith.constant 6 : index
    %c0_80 = arith.constant 0 : index
    %87 = vector.load %arg5[%c6, %c0_80] : memref<25x128xf32, #tpu.memory_space<vmem>>, vector<1x128xf32>
    %88 = vector.shape_cast %87 : vector<1x128xf32> to vector<1x1x128xf32>
    %c7 = arith.constant 7 : index
    %c0_81 = arith.constant 0 : index
    %89 = vector.load %arg5[%c7, %c0_81] : memref<25x128xf32, #tpu.memory_space<vmem>>, vector<1x128xf32>
    %90 = vector.shape_cast %89 : vector<1x128xf32> to vector<1x1x128xf32>
    %c8 = arith.constant 8 : index
    %c0_82 = arith.constant 0 : index
    %91 = vector.load %arg5[%c8, %c0_82] : memref<25x128xf32, #tpu.memory_space<vmem>>, vector<1x128xf32>
    %92 = vector.shape_cast %91 : vector<1x128xf32> to vector<1x1x128xf32>
    %c9_83 = arith.constant 9 : index
    %c0_84 = arith.constant 0 : index
    %93 = vector.load %arg5[%c9_83, %c0_84] : memref<25x128xf32, #tpu.memory_space<vmem>>, vector<1x128xf32>
    %94 = vector.shape_cast %93 : vector<1x128xf32> to vector<1x1x128xf32>
    %c10 = arith.constant 10 : index
    %c0_85 = arith.constant 0 : index
    %95 = vector.load %arg5[%c10, %c0_85] : memref<25x128xf32, #tpu.memory_space<vmem>>, vector<1x128xf32>
    %96 = vector.shape_cast %95 : vector<1x128xf32> to vector<1x1x128xf32>
    %c11 = arith.constant 11 : index
    %c0_86 = arith.constant 0 : index
    %97 = vector.load %arg5[%c11, %c0_86] : memref<25x128xf32, #tpu.memory_space<vmem>>, vector<1x128xf32>
    %98 = vector.shape_cast %97 : vector<1x128xf32> to vector<1x1x128xf32>
    %c12 = arith.constant 12 : index
    %c0_87 = arith.constant 0 : index
    %99 = vector.load %arg5[%c12, %c0_87] : memref<25x128xf32, #tpu.memory_space<vmem>>, vector<1x128xf32>
    %100 = vector.shape_cast %99 : vector<1x128xf32> to vector<1x1x128xf32>
    %c13 = arith.constant 13 : index
    %c0_88 = arith.constant 0 : index
    %101 = vector.load %arg5[%c13, %c0_88] : memref<25x128xf32, #tpu.memory_space<vmem>>, vector<1x128xf32>
    %102 = vector.shape_cast %101 : vector<1x128xf32> to vector<1x1x128xf32>
    %c14 = arith.constant 14 : index
    %c0_89 = arith.constant 0 : index
    %103 = vector.load %arg5[%c14, %c0_89] : memref<25x128xf32, #tpu.memory_space<vmem>>, vector<1x128xf32>
    %104 = vector.shape_cast %103 : vector<1x128xf32> to vector<1x1x128xf32>
    %c15 = arith.constant 15 : index
    %c0_90 = arith.constant 0 : index
    %105 = vector.load %arg5[%c15, %c0_90] : memref<25x128xf32, #tpu.memory_space<vmem>>, vector<1x128xf32>
    %106 = vector.shape_cast %105 : vector<1x128xf32> to vector<1x1x128xf32>
    %c16 = arith.constant 16 : index
    %c0_91 = arith.constant 0 : index
    %107 = vector.load %arg5[%c16, %c0_91] : memref<25x128xf32, #tpu.memory_space<vmem>>, vector<1x128xf32>
    %108 = vector.shape_cast %107 : vector<1x128xf32> to vector<1x1x128xf32>
    %c17 = arith.constant 17 : index
    %c0_92 = arith.constant 0 : index
    %109 = vector.load %arg5[%c17, %c0_92] : memref<25x128xf32, #tpu.memory_space<vmem>>, vector<1x128xf32>
    %110 = vector.shape_cast %109 : vector<1x128xf32> to vector<1x1x128xf32>
    %c18 = arith.constant 18 : index
    %c0_93 = arith.constant 0 : index
    %111 = vector.load %arg5[%c18, %c0_93] : memref<25x128xf32, #tpu.memory_space<vmem>>, vector<1x128xf32>
    %112 = vector.shape_cast %111 : vector<1x128xf32> to vector<1x1x128xf32>
    %c19 = arith.constant 19 : index
    %c0_94 = arith.constant 0 : index
    %113 = vector.load %arg5[%c19, %c0_94] : memref<25x128xf32, #tpu.memory_space<vmem>>, vector<1x128xf32>
    %114 = vector.shape_cast %113 : vector<1x128xf32> to vector<1x1x128xf32>
    %c20 = arith.constant 20 : index
    %c0_95 = arith.constant 0 : index
    %115 = vector.load %arg5[%c20, %c0_95] : memref<25x128xf32, #tpu.memory_space<vmem>>, vector<1x128xf32>
    %116 = vector.shape_cast %115 : vector<1x128xf32> to vector<1x1x128xf32>
    %c21 = arith.constant 21 : index
    %c0_96 = arith.constant 0 : index
    %117 = vector.load %arg5[%c21, %c0_96] : memref<25x128xf32, #tpu.memory_space<vmem>>, vector<1x128xf32>
    %118 = vector.shape_cast %117 : vector<1x128xf32> to vector<1x1x128xf32>
    %c22 = arith.constant 22 : index
    %c0_97 = arith.constant 0 : index
    %119 = vector.load %arg5[%c22, %c0_97] : memref<25x128xf32, #tpu.memory_space<vmem>>, vector<1x128xf32>
    %120 = vector.shape_cast %119 : vector<1x128xf32> to vector<1x1x128xf32>
    %c23 = arith.constant 23 : index
    %c0_98 = arith.constant 0 : index
    %121 = vector.load %arg5[%c23, %c0_98] : memref<25x128xf32, #tpu.memory_space<vmem>>, vector<1x128xf32>
    %122 = vector.shape_cast %121 : vector<1x128xf32> to vector<1x1x128xf32>
    %c24 = arith.constant 24 : index
    %c0_99 = arith.constant 0 : index
    %123 = vector.load %arg5[%c24, %c0_99] : memref<25x128xf32, #tpu.memory_space<vmem>>, vector<1x128xf32>
    %124 = vector.shape_cast %123 : vector<1x128xf32> to vector<1x1x128xf32>
    %c0_100 = arith.constant 0 : index
    %c0_101 = arith.constant 0 : index
    %125 = vector.load %arg6[%c0_100, %c0_101] : memref<1x128xf32, #tpu.memory_space<vmem>>, vector<1x128xf32>
    %126 = vector.shape_cast %125 : vector<1x128xf32> to vector<1x1x128xf32>
    %127 = vector.shape_cast %126 : vector<1x1x128xf32> to vector<1x1x128xf32>
    %128 = vector.broadcast %127 : vector<1x1x128xf32> to vector<4x8x128xf32>
    %c0_102 = arith.constant 0 : index
    %c0_103 = arith.constant 0 : index
    %c0_104 = arith.constant 0 : index
    %c0_105 = arith.constant 0 : index
    %129 = vector.load %arg9[%c0_102, %c0_103, %c0_104, %c0_105] : memref<5x12x8x128xf32, #tpu.memory_space<vmem>>, vector<1x8x8x128xf32>
    %130 = vector.shape_cast %129 : vector<1x8x8x128xf32> to vector<8x8x128xf32>
    %131 = vector.extract_strided_slice %130 {offsets = [0, 0, 0], sizes = [4, 8, 128], strides = [1, 1, 1]} : vector<8x8x128xf32> to vector<4x8x128xf32>
    %132 = vector.broadcast %76 : vector<1x1x128xf32> to vector<4x8x128xf32>
    %133 = arith.mulf %131, %132 : vector<4x8x128xf32>
    %134 = arith.addf %128, %133 : vector<4x8x128xf32>
    %135 = vector.extract_strided_slice %130 {offsets = [1, 0, 0], sizes = [4, 8, 128], strides = [1, 1, 1]} : vector<8x8x128xf32> to vector<4x8x128xf32>
    %136 = vector.broadcast %86 : vector<1x1x128xf32> to vector<4x8x128xf32>
    %137 = arith.mulf %135, %136 : vector<4x8x128xf32>
    %138 = arith.addf %134, %137 : vector<4x8x128xf32>
    %139 = vector.extract_strided_slice %130 {offsets = [2, 0, 0], sizes = [4, 8, 128], strides = [1, 1, 1]} : vector<8x8x128xf32> to vector<4x8x128xf32>
    %140 = vector.broadcast %96 : vector<1x1x128xf32> to vector<4x8x128xf32>
    %141 = arith.mulf %139, %140 : vector<4x8x128xf32>
    %142 = arith.addf %138, %141 : vector<4x8x128xf32>
    %143 = vector.extract_strided_slice %130 {offsets = [3, 0, 0], sizes = [4, 8, 128], strides = [1, 1, 1]} : vector<8x8x128xf32> to vector<4x8x128xf32>
    %144 = vector.broadcast %106 : vector<1x1x128xf32> to vector<4x8x128xf32>
    %145 = arith.mulf %143, %144 : vector<4x8x128xf32>
    %146 = arith.addf %142, %145 : vector<4x8x128xf32>
    %147 = vector.extract_strided_slice %130 {offsets = [4, 0, 0], sizes = [4, 8, 128], strides = [1, 1, 1]} : vector<8x8x128xf32> to vector<4x8x128xf32>
    %148 = vector.broadcast %116 : vector<1x1x128xf32> to vector<4x8x128xf32>
    %149 = arith.mulf %147, %148 : vector<4x8x128xf32>
    %150 = arith.addf %146, %149 : vector<4x8x128xf32>
    %c1_106 = arith.constant 1 : index
    %c0_107 = arith.constant 0 : index
    %c0_108 = arith.constant 0 : index
    %c0_109 = arith.constant 0 : index
    %151 = vector.load %arg9[%c1_106, %c0_107, %c0_108, %c0_109] : memref<5x12x8x128xf32, #tpu.memory_space<vmem>>, vector<1x8x8x128xf32>
    %152 = vector.shape_cast %151 : vector<1x8x8x128xf32> to vector<8x8x128xf32>
    %153 = vector.extract_strided_slice %152 {offsets = [0, 0, 0], sizes = [4, 8, 128], strides = [1, 1, 1]} : vector<8x8x128xf32> to vector<4x8x128xf32>
    %154 = vector.broadcast %78 : vector<1x1x128xf32> to vector<4x8x128xf32>
    %155 = arith.mulf %153, %154 : vector<4x8x128xf32>
    %156 = arith.addf %150, %155 : vector<4x8x128xf32>
    %157 = vector.extract_strided_slice %152 {offsets = [1, 0, 0], sizes = [4, 8, 128], strides = [1, 1, 1]} : vector<8x8x128xf32> to vector<4x8x128xf32>
    %158 = vector.broadcast %88 : vector<1x1x128xf32> to vector<4x8x128xf32>
    %159 = arith.mulf %157, %158 : vector<4x8x128xf32>
    %160 = arith.addf %156, %159 : vector<4x8x128xf32>
    %161 = vector.extract_strided_slice %152 {offsets = [2, 0, 0], sizes = [4, 8, 128], strides = [1, 1, 1]} : vector<8x8x128xf32> to vector<4x8x128xf32>
    %162 = vector.broadcast %98 : vector<1x1x128xf32> to vector<4x8x128xf32>
    %163 = arith.mulf %161, %162 : vector<4x8x128xf32>
    %164 = arith.addf %160, %163 : vector<4x8x128xf32>
    %165 = vector.extract_strided_slice %152 {offsets = [3, 0, 0], sizes = [4, 8, 128], strides = [1, 1, 1]} : vector<8x8x128xf32> to vector<4x8x128xf32>
    %166 = vector.broadcast %108 : vector<1x1x128xf32> to vector<4x8x128xf32>
    %167 = arith.mulf %165, %166 : vector<4x8x128xf32>
    %168 = arith.addf %164, %167 : vector<4x8x128xf32>
    %169 = vector.extract_strided_slice %152 {offsets = [4, 0, 0], sizes = [4, 8, 128], strides = [1, 1, 1]} : vector<8x8x128xf32> to vector<4x8x128xf32>
    %170 = vector.broadcast %118 : vector<1x1x128xf32> to vector<4x8x128xf32>
    %171 = arith.mulf %169, %170 : vector<4x8x128xf32>
    %172 = arith.addf %168, %171 : vector<4x8x128xf32>
    %c2_110 = arith.constant 2 : index
    %c0_111 = arith.constant 0 : index
    %c0_112 = arith.constant 0 : index
    %c0_113 = arith.constant 0 : index
    %173 = vector.load %arg9[%c2_110, %c0_111, %c0_112, %c0_113] : memref<5x12x8x128xf32, #tpu.memory_space<vmem>>, vector<1x8x8x128xf32>
    %174 = vector.shape_cast %173 : vector<1x8x8x128xf32> to vector<8x8x128xf32>
    %175 = vector.extract_strided_slice %174 {offsets = [0, 0, 0], sizes = [4, 8, 128], strides = [1, 1, 1]} : vector<8x8x128xf32> to vector<4x8x128xf32>
    %176 = vector.broadcast %80 : vector<1x1x128xf32> to vector<4x8x128xf32>
    %177 = arith.mulf %175, %176 : vector<4x8x128xf32>
    %178 = arith.addf %172, %177 : vector<4x8x128xf32>
    %179 = vector.extract_strided_slice %174 {offsets = [1, 0, 0], sizes = [4, 8, 128], strides = [1, 1, 1]} : vector<8x8x128xf32> to vector<4x8x128xf32>
    %180 = vector.broadcast %90 : vector<1x1x128xf32> to vector<4x8x128xf32>
    %181 = arith.mulf %179, %180 : vector<4x8x128xf32>
    %182 = arith.addf %178, %181 : vector<4x8x128xf32>
    %183 = vector.extract_strided_slice %174 {offsets = [2, 0, 0], sizes = [4, 8, 128], strides = [1, 1, 1]} : vector<8x8x128xf32> to vector<4x8x128xf32>
    %184 = vector.broadcast %100 : vector<1x1x128xf32> to vector<4x8x128xf32>
    %185 = arith.mulf %183, %184 : vector<4x8x128xf32>
    %186 = arith.addf %182, %185 : vector<4x8x128xf32>
    %187 = vector.extract_strided_slice %174 {offsets = [3, 0, 0], sizes = [4, 8, 128], strides = [1, 1, 1]} : vector<8x8x128xf32> to vector<4x8x128xf32>
    %188 = vector.broadcast %110 : vector<1x1x128xf32> to vector<4x8x128xf32>
    %189 = arith.mulf %187, %188 : vector<4x8x128xf32>
    %190 = arith.addf %186, %189 : vector<4x8x128xf32>
    %191 = vector.extract_strided_slice %174 {offsets = [4, 0, 0], sizes = [4, 8, 128], strides = [1, 1, 1]} : vector<8x8x128xf32> to vector<4x8x128xf32>
    %192 = vector.broadcast %120 : vector<1x1x128xf32> to vector<4x8x128xf32>
    %193 = arith.mulf %191, %192 : vector<4x8x128xf32>
    %194 = arith.addf %190, %193 : vector<4x8x128xf32>
    %c3_114 = arith.constant 3 : index
    %c0_115 = arith.constant 0 : index
    %c0_116 = arith.constant 0 : index
    %c0_117 = arith.constant 0 : index
    %195 = vector.load %arg9[%c3_114, %c0_115, %c0_116, %c0_117] : memref<5x12x8x128xf32, #tpu.memory_space<vmem>>, vector<1x8x8x128xf32>
    %196 = vector.shape_cast %195 : vector<1x8x8x128xf32> to vector<8x8x128xf32>
    %197 = vector.extract_strided_slice %196 {offsets = [0, 0, 0], sizes = [4, 8, 128], strides = [1, 1, 1]} : vector<8x8x128xf32> to vector<4x8x128xf32>
    %198 = vector.broadcast %82 : vector<1x1x128xf32> to vector<4x8x128xf32>
    %199 = arith.mulf %197, %198 : vector<4x8x128xf32>
    %200 = arith.addf %194, %199 : vector<4x8x128xf32>
    %201 = vector.extract_strided_slice %196 {offsets = [1, 0, 0], sizes = [4, 8, 128], strides = [1, 1, 1]} : vector<8x8x128xf32> to vector<4x8x128xf32>
    %202 = vector.broadcast %92 : vector<1x1x128xf32> to vector<4x8x128xf32>
    %203 = arith.mulf %201, %202 : vector<4x8x128xf32>
    %204 = arith.addf %200, %203 : vector<4x8x128xf32>
    %205 = vector.extract_strided_slice %196 {offsets = [2, 0, 0], sizes = [4, 8, 128], strides = [1, 1, 1]} : vector<8x8x128xf32> to vector<4x8x128xf32>
    %206 = vector.broadcast %102 : vector<1x1x128xf32> to vector<4x8x128xf32>
    %207 = arith.mulf %205, %206 : vector<4x8x128xf32>
    %208 = arith.addf %204, %207 : vector<4x8x128xf32>
    %209 = vector.extract_strided_slice %196 {offsets = [3, 0, 0], sizes = [4, 8, 128], strides = [1, 1, 1]} : vector<8x8x128xf32> to vector<4x8x128xf32>
    %210 = vector.broadcast %112 : vector<1x1x128xf32> to vector<4x8x128xf32>
    %211 = arith.mulf %209, %210 : vector<4x8x128xf32>
    %212 = arith.addf %208, %211 : vector<4x8x128xf32>
    %213 = vector.extract_strided_slice %196 {offsets = [4, 0, 0], sizes = [4, 8, 128], strides = [1, 1, 1]} : vector<8x8x128xf32> to vector<4x8x128xf32>
    %214 = vector.broadcast %122 : vector<1x1x128xf32> to vector<4x8x128xf32>
    %215 = arith.mulf %213, %214 : vector<4x8x128xf32>
    %216 = arith.addf %212, %215 : vector<4x8x128xf32>
    %c4_118 = arith.constant 4 : index
    %c0_119 = arith.constant 0 : index
    %c0_120 = arith.constant 0 : index
    %c0_121 = arith.constant 0 : index
    %217 = vector.load %arg9[%c4_118, %c0_119, %c0_120, %c0_121] : memref<5x12x8x128xf32, #tpu.memory_space<vmem>>, vector<1x8x8x128xf32>
    %218 = vector.shape_cast %217 : vector<1x8x8x128xf32> to vector<8x8x128xf32>
    %219 = vector.extract_strided_slice %218 {offsets = [0, 0, 0], sizes = [4, 8, 128], strides = [1, 1, 1]} : vector<8x8x128xf32> to vector<4x8x128xf32>
    %220 = vector.broadcast %84 : vector<1x1x128xf32> to vector<4x8x128xf32>
    %221 = arith.mulf %219, %220 : vector<4x8x128xf32>
    %222 = arith.addf %216, %221 : vector<4x8x128xf32>
    %223 = vector.extract_strided_slice %218 {offsets = [1, 0, 0], sizes = [4, 8, 128], strides = [1, 1, 1]} : vector<8x8x128xf32> to vector<4x8x128xf32>
    %224 = vector.broadcast %94 : vector<1x1x128xf32> to vector<4x8x128xf32>
    %225 = arith.mulf %223, %224 : vector<4x8x128xf32>
    %226 = arith.addf %222, %225 : vector<4x8x128xf32>
    %227 = vector.extract_strided_slice %218 {offsets = [2, 0, 0], sizes = [4, 8, 128], strides = [1, 1, 1]} : vector<8x8x128xf32> to vector<4x8x128xf32>
    %228 = vector.broadcast %104 : vector<1x1x128xf32> to vector<4x8x128xf32>
    %229 = arith.mulf %227, %228 : vector<4x8x128xf32>
    %230 = arith.addf %226, %229 : vector<4x8x128xf32>
    %231 = vector.extract_strided_slice %218 {offsets = [3, 0, 0], sizes = [4, 8, 128], strides = [1, 1, 1]} : vector<8x8x128xf32> to vector<4x8x128xf32>
    %232 = vector.broadcast %114 : vector<1x1x128xf32> to vector<4x8x128xf32>
    %233 = arith.mulf %231, %232 : vector<4x8x128xf32>
    %234 = arith.addf %230, %233 : vector<4x8x128xf32>
    %235 = vector.extract_strided_slice %218 {offsets = [4, 0, 0], sizes = [4, 8, 128], strides = [1, 1, 1]} : vector<8x8x128xf32> to vector<4x8x128xf32>
    %236 = vector.broadcast %124 : vector<1x1x128xf32> to vector<4x8x128xf32>
    %237 = arith.mulf %235, %236 : vector<4x8x128xf32>
    %238 = arith.addf %234, %237 : vector<4x8x128xf32>
    %cst_122 = arith.constant 5.000000e-01 : f32
    %239 = vector.broadcast %cst_122 : f32 to vector<4x8x128xf32>
    %240 = arith.mulf %239, %238 : vector<4x8x128xf32>
    %cst_123 = arith.constant 0.707106769 : f32
    %241 = vector.broadcast %cst_123 : f32 to vector<4x8x128xf32>
    %242 = arith.mulf %238, %241 : vector<4x8x128xf32>
    %243 = math.erf %242 : vector<4x8x128xf32>
    %cst_124 = arith.constant 1.000000e+00 : f32
    %244 = vector.broadcast %cst_124 : f32 to vector<4x8x128xf32>
    %245 = arith.addf %244, %243 : vector<4x8x128xf32>
    %246 = arith.mulf %240, %245 : vector<4x8x128xf32>
    %c0_125 = arith.constant 0 : index
    %c0_126 = arith.constant 0 : index
    %c0_127 = arith.constant 0 : index
    %c0_128 = arith.constant 0 : index
    %247 = vector.load %arg7[%c0_125, %c0_126, %c0_127, %c0_128] : memref<1x8x8x128xf32, #tpu.memory_space<vmem>>, vector<1x4x8x128xf32>
    %248 = vector.shape_cast %247 : vector<1x4x8x128xf32> to vector<4x8x128xf32>
    %249 = vector.shape_cast %246 : vector<4x8x128xf32> to vector<1x4x8x128xf32>
    tpu.vector_store %arg7[%c0_125, %c0_126, %c0_127, %c0_128], %249 {strides = array<i32>} : memref<1x8x8x128xf32, #tpu.memory_space<vmem>>, vector<1x4x8x128xf32>,
    %250 = vector.shape_cast %126 : vector<1x1x128xf32> to vector<1x1x128xf32>
    %251 = vector.broadcast %250 : vector<1x1x128xf32> to vector<4x8x128xf32>
    %c0_129 = arith.constant 0 : index
    %c4_130 = arith.constant 4 : index
    %c0_131 = arith.constant 0 : index
    %c0_132 = arith.constant 0 : index
    %252 = vector.load %arg9[%c0_129, %c4_130, %c0_131, %c0_132] : memref<5x12x8x128xf32, #tpu.memory_space<vmem>>, vector<1x8x8x128xf32>
    %253 = vector.shape_cast %252 : vector<1x8x8x128xf32> to vector<8x8x128xf32>
    %254 = vector.extract_strided_slice %253 {offsets = [0, 0, 0], sizes = [4, 8, 128], strides = [1, 1, 1]} : vector<8x8x128xf32> to vector<4x8x128xf32>
    %255 = vector.broadcast %76 : vector<1x1x128xf32> to vector<4x8x128xf32>
    %256 = arith.mulf %254, %255 : vector<4x8x128xf32>
    %257 = arith.addf %251, %256 : vector<4x8x128xf32>
    %258 = vector.extract_strided_slice %253 {offsets = [1, 0, 0], sizes = [4, 8, 128], strides = [1, 1, 1]} : vector<8x8x128xf32> to vector<4x8x128xf32>
    %259 = vector.broadcast %86 : vector<1x1x128xf32> to vector<4x8x128xf32>
    %260 = arith.mulf %258, %259 : vector<4x8x128xf32>
    %261 = arith.addf %257, %260 : vector<4x8x128xf32>
    %262 = vector.extract_strided_slice %253 {offsets = [2, 0, 0], sizes = [4, 8, 128], strides = [1, 1, 1]} : vector<8x8x128xf32> to vector<4x8x128xf32>
    %263 = vector.broadcast %96 : vector<1x1x128xf32> to vector<4x8x128xf32>
    %264 = arith.mulf %262, %263 : vector<4x8x128xf32>
    %265 = arith.addf %261, %264 : vector<4x8x128xf32>
    %266 = vector.extract_strided_slice %253 {offsets = [3, 0, 0], sizes = [4, 8, 128], strides = [1, 1, 1]} : vector<8x8x128xf32> to vector<4x8x128xf32>
    %267 = vector.broadcast %106 : vector<1x1x128xf32> to vector<4x8x128xf32>
    %268 = arith.mulf %266, %267 : vector<4x8x128xf32>
    %269 = arith.addf %265, %268 : vector<4x8x128xf32>
    %270 = vector.extract_strided_slice %253 {offsets = [4, 0, 0], sizes = [4, 8, 128], strides = [1, 1, 1]} : vector<8x8x128xf32> to vector<4x8x128xf32>
    %271 = vector.broadcast %116 : vector<1x1x128xf32> to vector<4x8x128xf32>
    %272 = arith.mulf %270, %271 : vector<4x8x128xf32>
    %273 = arith.addf %269, %272 : vector<4x8x128xf32>
    %c1_133 = arith.constant 1 : index
    %c4_134 = arith.constant 4 : index
    %c0_135 = arith.constant 0 : index
    %c0_136 = arith.constant 0 : index
    %274 = vector.load %arg9[%c1_133, %c4_134, %c0_135, %c0_136] : memref<5x12x8x128xf32, #tpu.memory_space<vmem>>, vector<1x8x8x128xf32>
    %275 = vector.shape_cast %274 : vector<1x8x8x128xf32> to vector<8x8x128xf32>
    %276 = vector.extract_strided_slice %275 {offsets = [0, 0, 0], sizes = [4, 8, 128], strides = [1, 1, 1]} : vector<8x8x128xf32> to vector<4x8x128xf32>
    %277 = vector.broadcast %78 : vector<1x1x128xf32> to vector<4x8x128xf32>
    %278 = arith.mulf %276, %277 : vector<4x8x128xf32>
    %279 = arith.addf %273, %278 : vector<4x8x128xf32>
    %280 = vector.extract_strided_slice %275 {offsets = [1, 0, 0], sizes = [4, 8, 128], strides = [1, 1, 1]} : vector<8x8x128xf32> to vector<4x8x128xf32>
    %281 = vector.broadcast %88 : vector<1x1x128xf32> to vector<4x8x128xf32>
    %282 = arith.mulf %280, %281 : vector<4x8x128xf32>
    %283 = arith.addf %279, %282 : vector<4x8x128xf32>
    %284 = vector.extract_strided_slice %275 {offsets = [2, 0, 0], sizes = [4, 8, 128], strides = [1, 1, 1]} : vector<8x8x128xf32> to vector<4x8x128xf32>
    %285 = vector.broadcast %98 : vector<1x1x128xf32> to vector<4x8x128xf32>
    %286 = arith.mulf %284, %285 : vector<4x8x128xf32>
    %287 = arith.addf %283, %286 : vector<4x8x128xf32>
    %288 = vector.extract_strided_slice %275 {offsets = [3, 0, 0], sizes = [4, 8, 128], strides = [1, 1, 1]} : vector<8x8x128xf32> to vector<4x8x128xf32>
    %289 = vector.broadcast %108 : vector<1x1x128xf32> to vector<4x8x128xf32>
    %290 = arith.mulf %288, %289 : vector<4x8x128xf32>
    %291 = arith.addf %287, %290 : vector<4x8x128xf32>
    %292 = vector.extract_strided_slice %275 {offsets = [4, 0, 0], sizes = [4, 8, 128], strides = [1, 1, 1]} : vector<8x8x128xf32> to vector<4x8x128xf32>
    %293 = vector.broadcast %118 : vector<1x1x128xf32> to vector<4x8x128xf32>
    %294 = arith.mulf %292, %293 : vector<4x8x128xf32>
    %295 = arith.addf %291, %294 : vector<4x8x128xf32>
    %c2_137 = arith.constant 2 : index
    %c4_138 = arith.constant 4 : index
    %c0_139 = arith.constant 0 : index
    %c0_140 = arith.constant 0 : index
    %296 = vector.load %arg9[%c2_137, %c4_138, %c0_139, %c0_140] : memref<5x12x8x128xf32, #tpu.memory_space<vmem>>, vector<1x8x8x128xf32>
    %297 = vector.shape_cast %296 : vector<1x8x8x128xf32> to vector<8x8x128xf32>
    %298 = vector.extract_strided_slice %297 {offsets = [0, 0, 0], sizes = [4, 8, 128], strides = [1, 1, 1]} : vector<8x8x128xf32> to vector<4x8x128xf32>
    %299 = vector.broadcast %80 : vector<1x1x128xf32> to vector<4x8x128xf32>
    %300 = arith.mulf %298, %299 : vector<4x8x128xf32>
    %301 = arith.addf %295, %300 : vector<4x8x128xf32>
    %302 = vector.extract_strided_slice %297 {offsets = [1, 0, 0], sizes = [4, 8, 128], strides = [1, 1, 1]} : vector<8x8x128xf32> to vector<4x8x128xf32>
    %303 = vector.broadcast %90 : vector<1x1x128xf32> to vector<4x8x128xf32>
    %304 = arith.mulf %302, %303 : vector<4x8x128xf32>
    %305 = arith.addf %301, %304 : vector<4x8x128xf32>
    %306 = vector.extract_strided_slice %297 {offsets = [2, 0, 0], sizes = [4, 8, 128], strides = [1, 1, 1]} : vector<8x8x128xf32> to vector<4x8x128xf32>
    %307 = vector.broadcast %100 : vector<1x1x128xf32> to vector<4x8x128xf32>
    %308 = arith.mulf %306, %307 : vector<4x8x128xf32>
    %309 = arith.addf %305, %308 : vector<4x8x128xf32>
    %310 = vector.extract_strided_slice %297 {offsets = [3, 0, 0], sizes = [4, 8, 128], strides = [1, 1, 1]} : vector<8x8x128xf32> to vector<4x8x128xf32>
    %311 = vector.broadcast %110 : vector<1x1x128xf32> to vector<4x8x128xf32>
    %312 = arith.mulf %310, %311 : vector<4x8x128xf32>
    %313 = arith.addf %309, %312 : vector<4x8x128xf32>
    %314 = vector.extract_strided_slice %297 {offsets = [4, 0, 0], sizes = [4, 8, 128], strides = [1, 1, 1]} : vector<8x8x128xf32> to vector<4x8x128xf32>
    %315 = vector.broadcast %120 : vector<1x1x128xf32> to vector<4x8x128xf32>
    %316 = arith.mulf %314, %315 : vector<4x8x128xf32>
    %317 = arith.addf %313, %316 : vector<4x8x128xf32>
    %c3_141 = arith.constant 3 : index
    %c4_142 = arith.constant 4 : index
    %c0_143 = arith.constant 0 : index
    %c0_144 = arith.constant 0 : index
    %318 = vector.load %arg9[%c3_141, %c4_142, %c0_143, %c0_144] : memref<5x12x8x128xf32, #tpu.memory_space<vmem>>, vector<1x8x8x128xf32>
    %319 = vector.shape_cast %318 : vector<1x8x8x128xf32> to vector<8x8x128xf32>
    %320 = vector.extract_strided_slice %319 {offsets = [0, 0, 0], sizes = [4, 8, 128], strides = [1, 1, 1]} : vector<8x8x128xf32> to vector<4x8x128xf32>
    %321 = vector.broadcast %82 : vector<1x1x128xf32> to vector<4x8x128xf32>
    %322 = arith.mulf %320, %321 : vector<4x8x128xf32>
    %323 = arith.addf %317, %322 : vector<4x8x128xf32>
    %324 = vector.extract_strided_slice %319 {offsets = [1, 0, 0], sizes = [4, 8, 128], strides = [1, 1, 1]} : vector<8x8x128xf32> to vector<4x8x128xf32>
    %325 = vector.broadcast %92 : vector<1x1x128xf32> to vector<4x8x128xf32>
    %326 = arith.mulf %324, %325 : vector<4x8x128xf32>
    %327 = arith.addf %323, %326 : vector<4x8x128xf32>
    %328 = vector.extract_strided_slice %319 {offsets = [2, 0, 0], sizes = [4, 8, 128], strides = [1, 1, 1]} : vector<8x8x128xf32> to vector<4x8x128xf32>
    %329 = vector.broadcast %102 : vector<1x1x128xf32> to vector<4x8x128xf32>
    %330 = arith.mulf %328, %329 : vector<4x8x128xf32>
    %331 = arith.addf %327, %330 : vector<4x8x128xf32>
    %332 = vector.extract_strided_slice %319 {offsets = [3, 0, 0], sizes = [4, 8, 128], strides = [1, 1, 1]} : vector<8x8x128xf32> to vector<4x8x128xf32>
    %333 = vector.broadcast %112 : vector<1x1x128xf32> to vector<4x8x128xf32>
    %334 = arith.mulf %332, %333 : vector<4x8x128xf32>
    %335 = arith.addf %331, %334 : vector<4x8x128xf32>
    %336 = vector.extract_strided_slice %319 {offsets = [4, 0, 0], sizes = [4, 8, 128], strides = [1, 1, 1]} : vector<8x8x128xf32> to vector<4x8x128xf32>
    %337 = vector.broadcast %122 : vector<1x1x128xf32> to vector<4x8x128xf32>
    %338 = arith.mulf %336, %337 : vector<4x8x128xf32>
    %339 = arith.addf %335, %338 : vector<4x8x128xf32>
    %c4_145 = arith.constant 4 : index
    %c4_146 = arith.constant 4 : index
    %c0_147 = arith.constant 0 : index
    %c0_148 = arith.constant 0 : index
    %340 = vector.load %arg9[%c4_145, %c4_146, %c0_147, %c0_148] : memref<5x12x8x128xf32, #tpu.memory_space<vmem>>, vector<1x8x8x128xf32>
    %341 = vector.shape_cast %340 : vector<1x8x8x128xf32> to vector<8x8x128xf32>
    %342 = vector.extract_strided_slice %341 {offsets = [0, 0, 0], sizes = [4, 8, 128], strides = [1, 1, 1]} : vector<8x8x128xf32> to vector<4x8x128xf32>
    %343 = vector.broadcast %84 : vector<1x1x128xf32> to vector<4x8x128xf32>
    %344 = arith.mulf %342, %343 : vector<4x8x128xf32>
    %345 = arith.addf %339, %344 : vector<4x8x128xf32>
    %346 = vector.extract_strided_slice %341 {offsets = [1, 0, 0], sizes = [4, 8, 128], strides = [1, 1, 1]} : vector<8x8x128xf32> to vector<4x8x128xf32>
    %347 = vector.broadcast %94 : vector<1x1x128xf32> to vector<4x8x128xf32>
    %348 = arith.mulf %346, %347 : vector<4x8x128xf32>
    %349 = arith.addf %345, %348 : vector<4x8x128xf32>
    %350 = vector.extract_strided_slice %341 {offsets = [2, 0, 0], sizes = [4, 8, 128], strides = [1, 1, 1]} : vector<8x8x128xf32> to vector<4x8x128xf32>
    %351 = vector.broadcast %104 : vector<1x1x128xf32> to vector<4x8x128xf32>
    %352 = arith.mulf %350, %351 : vector<4x8x128xf32>
    %353 = arith.addf %349, %352 : vector<4x8x128xf32>
    %354 = vector.extract_strided_slice %341 {offsets = [3, 0, 0], sizes = [4, 8, 128], strides = [1, 1, 1]} : vector<8x8x128xf32> to vector<4x8x128xf32>
    %355 = vector.broadcast %114 : vector<1x1x128xf32> to vector<4x8x128xf32>
    %356 = arith.mulf %354, %355 : vector<4x8x128xf32>
    %357 = arith.addf %353, %356 : vector<4x8x128xf32>
    %358 = vector.extract_strided_slice %341 {offsets = [4, 0, 0], sizes = [4, 8, 128], strides = [1, 1, 1]} : vector<8x8x128xf32> to vector<4x8x128xf32>
    %359 = vector.broadcast %124 : vector<1x1x128xf32> to vector<4x8x128xf32>
    %360 = arith.mulf %358, %359 : vector<4x8x128xf32>
    %361 = arith.addf %357, %360 : vector<4x8x128xf32>
    %cst_149 = arith.constant 5.000000e-01 : f32
    %362 = vector.broadcast %cst_149 : f32 to vector<4x8x128xf32>
    %363 = arith.mulf %362, %361 : vector<4x8x128xf32>
    %cst_150 = arith.constant 0.707106769 : f32
    %364 = vector.broadcast %cst_150 : f32 to vector<4x8x128xf32>
    %365 = arith.mulf %361, %364 : vector<4x8x128xf32>
    %366 = math.erf %365 : vector<4x8x128xf32>
    %cst_151 = arith.constant 1.000000e+00 : f32
    %367 = vector.broadcast %cst_151 : f32 to vector<4x8x128xf32>
    %368 = arith.addf %367, %366 : vector<4x8x128xf32>
    %369 = arith.mulf %363, %368 : vector<4x8x128xf32>
    %c0_152 = arith.constant 0 : index
    %c4_153 = arith.constant 4 : index
    %c0_154 = arith.constant 0 : index
    %c0_155 = arith.constant 0 : index
    %370 = vector.load %arg7[%c0_152, %c4_153, %c0_154, %c0_155] : memref<1x8x8x128xf32, #tpu.memory_space<vmem>>, vector<1x4x8x128xf32>
    %371 = vector.shape_cast %370 : vector<1x4x8x128xf32> to vector<4x8x128xf32>
    %372 = vector.shape_cast %369 : vector<4x8x128xf32> to vector<1x4x8x128xf32>
    tpu.vector_store %arg7[%c0_152, %c4_153, %c0_154, %c0_155], %372 {strides = array<i32>} : memref<1x8x8x128xf32, #tpu.memory_space<vmem>>, vector<1x4x8x128xf32>,
    return
  }
  func.func @transform_0(%arg0: i32, %arg1: i32) -> (i32, i32, i32, i32) {
    %c0_i32 = arith.constant 0 : i32
    %c0_i32_0 = arith.constant 0 : i32
    %c0_i32_1 = arith.constant 0 : i32
    return %arg0, %arg1, %c0_i32, %c0_i32_0 : i32, i32, i32, i32
  }
  func.func @transform_1(%arg0: i32, %arg1: i32) -> (i32, i32, i32, i32) {
    %c4_i32 = arith.constant 4 : i32
    %0 = arith.muli %arg1, %c4_i32 : i32
    %c1_i32 = arith.constant 1 : i32
    %1 = arith.subi %0, %c1_i32 : i32
    %c0_i32 = arith.constant 0 : i32
    %c15_i32 = arith.constant 15 : i32
    %2 = arith.maxsi %c0_i32, %1 : i32
    %3 = arith.minsi %c15_i32, %2 : i32
    %c0_i32_0 = arith.constant 0 : i32
    %c0_i32_1 = arith.constant 0 : i32
    %c0_i32_2 = arith.constant 0 : i32
    return %arg0, %3, %c0_i32_0, %c0_i32_1 : i32, i32, i32, i32
  }
  func.func @transform_2(%arg0: i32, %arg1: i32) -> (i32, i32, i32, i32) {
    %c1_i32 = arith.constant 1 : i32
    %0 = arith.addi %arg1, %c1_i32 : i32
    %c4_i32 = arith.constant 4 : i32
    %1 = arith.muli %0, %c4_i32 : i32
    %c0_i32 = arith.constant 0 : i32
    %c15_i32 = arith.constant 15 : i32
    %2 = arith.maxsi %c0_i32, %1 : i32
    %3 = arith.minsi %c15_i32, %2 : i32
    %c0_i32_0 = arith.constant 0 : i32
    %c0_i32_1 = arith.constant 0 : i32
    %c0_i32_2 = arith.constant 0 : i32
    return %arg0, %3, %c0_i32_0, %c0_i32_1 : i32, i32, i32, i32
  }
  func.func @transform_3(%arg0: i32, %arg1: i32) -> (i32, i32) {
    %c0_i32 = arith.constant 0 : i32
    %c0_i32_0 = arith.constant 0 : i32
    %c0_i32_1 = arith.constant 0 : i32
    return %c0_i32, %c0_i32_0 : i32, i32
  }
  func.func @transform_4(%arg0: i32, %arg1: i32) -> (i32, i32) {
    %c0_i32 = arith.constant 0 : i32
    %c0_i32_0 = arith.constant 0 : i32
    %c0_i32_1 = arith.constant 0 : i32
    return %c0_i32, %c0_i32_0 : i32, i32
  }
  func.func @transform_5(%arg0: i32, %arg1: i32) -> (i32, i32, i32, i32) {
    %c0_i32 = arith.constant 0 : i32
    %c0_i32_0 = arith.constant 0 : i32
    %c0_i32_1 = arith.constant 0 : i32
    return %arg0, %arg1, %c0_i32, %c0_i32_0 : i32, i32, i32, i32
  }
}

</mosaic_0001>

<bundles_post_ra>
// kernel: tpu_custom_call.1
= control target key start
LH: loop header
LB: loop body
LE: loop exit
PB: predicated region body
PF: predicated region fallthrough
CT: control target
= control target key end

     0   :  { %s3587_s0 = inlined_call_operand.hbm [shape: f32[2,32,8,128], index: 0, kind: input, shape index: {}]   ;;  %s3588_s1 = inlined_call_operand.hbm [shape: f32[2,32,8,128], index: 1, kind: input, shape index: {}]   ;;  %s3589_s2 = inlined_call_operand.hbm [shape: f32[2,32,8,128], index: 2, kind: input, shape index: {}]   ;;  %s3590_s3 = inlined_call_operand.hbm [shape: f32[25,128], index: 3, kind: input, shape index: {}]   ;;  %s3591_s4 = inlined_call_operand.vmem [shape: f32[1,128], index: 4, kind: input, shape index: {}]   ;;  %s3592_s5 = inlined_call_operand.hbm [shape: f32[2,32,8,128], index: 5, kind: output, shape index: {}]  }
   0x1   :  { %3625 = sst [smem:[#allocation39_spill]] %s3587_s0 }
   0x2   :  { %3626 = sst [smem:[#allocation40_spill]] %s3588_s1 }
   0x3   :  { %3627 = sst [smem:[#allocation41_spill]] %s3589_s2 }
   0x4   :  { %3628 = sst [smem:[#allocation42_spill]] %s3590_s3 }
   0x5   :  { %3629 = sst [smem:[#allocation43_spill]] %s3591_s4 }
   0x6   :  { %3630 = sst [smem:[#allocation44_spill]] %s3592_s5 }
   0x7   :  { %10 = vsyncpa [#allocation5], 0 }
   0x8   :  { %12 = vsyncpa [#allocation5 + $0x1], 0 }
   0x9   :  { %13 = vsyncpa [#allocation8], 0 }
   0xa   :  { %15 = vsyncpa [#allocation8 + $0x1], 0 }
   0xb   :  { %16 = vsyncpa [#allocation11], 0 }
   0xc   :  { %17 = vsyncpa [#allocation6], 0 }
   0xd   :  { %19 = vsyncpa [#allocation6 + $0x1], 0  ;;  %s2348_s18 = smov 0   ;;  %s2350_s19 = smov 0  }
   0xe   :  { %s2352_s20 = smov 0   ;;  %s2354_s21 = smov 0  }
   0xf   :  { %s2356_s22 = smov 0   ;;  %s2358_s23 = smov 0  }
  0x10   :  { %s2360_s24 = smov 0   ;;  %s2362_s25 = smov 0  }
  0x11   :  { %s2364_s26 = smov 0   ;;  %s2366_s27 = smov 0  }
  0x12   :  { %s2368_s28 = smov 0   ;;  %s2370_s29 = smov 0  }
  0x13   :  { %s2372_s30 = smov 0   ;;  %s2374_s6 = smov 0  }
  0x14 LB: > { %3631 = sst [smem:[#allocation18_spill]] %s2249_s18  ;;  %s34_s7 = sadd.s32 1, %s2293_s29  ;;  %s2301_s6 = sphi %s2374_s6, %s25_s6   ;;  %s2297_s30 = sphi %s2372_s30, %s3721_s30   ;;  %s2293_s29 = sphi %s2370_s29, %s3720_s29   ;;  %s2289_s28 = sphi %s2368_s28, %s3719_s28   ;;  %s2285_s27 = sphi %s2366_s27, %s3718_s27   ;;  %s2281_s26 = sphi %s2364_s26, %s3717_s26   ;;  %s2277_s25 = sphi %s2362_s25, %s3726_s25   ;;  %s2273_s24 = sphi %s2360_s24, %s3725_s24   ;;  %s2269_s23 = sphi %s2358_s23, %s3715_s23   ;;  %s2265_s22 = sphi %s2356_s22, %s3724_s22   ;;  %s2261_s21 = sphi %s2354_s21, %s3723_s21   ;;  %s2257_s20 = sphi %s2352_s20, %s3722_s20   ;;  %s2253_s19 = sphi %s2350_s19, %s3713_s19   ;;  %s2249_s18 = sphi %s2348_s18, %s3712_s18  }
  0x15   : > { %3632 = sst [smem:[#allocation19_spill]] %s2253_s19  ;;  %s37_s8 = sadd.s32 1, %s2297_s30 }
  0x16   : > { %3633 = sst [smem:[#allocation20_spill]] %s2257_s20  ;;  %p35_p0 = scmp.ge.s32.totalorder %s34_s7, 4 }
  0x17   : > { %3634 = sst [smem:[#allocation21_spill]] %s2269_s23  ;;  %p3603_p1 = scmp.eq.s32.totalorder %s2301_s6, 0 }
  0x18   : > { %3635 = sst [smem:[#allocation22_spill]] %s2281_s26  ;;  %s1734_s9 = sshll.u32 %s2293_s29, 2 }
  0x19   : > { %3636 = sst [smem:[#allocation23_spill]] %s2285_s27  ;;  %s86_s10 = sadd.s32 1, %s2269_s23 }
  0x1a   : > { %3637 = sst [smem:[#allocation24_spill]] %s2289_s28  ;;  %s3728_s7 = smov (%p35_p0, %s34_s7), 0 }
  0x1b   : > { %3638 = sst [smem:[#allocation25_spill]] %s2293_s29  ;;  %s3730_s8 = smov (!%p35_p0, %s37_s8), %s2297_s30 }
  0x1c   : > { %3639 = sst [smem:[#allocation26_spill]] %s2297_s30  ;;  %s42_s11 = ssub.s32 %s2293_s29, %s3728_s7 }
  0x1d   : > { %3640 = sst [smem:[#allocation27_spill]] %s3728_s7  ;;  %s1735_s12 = sadd.s32 4294967295, %s1734_s9 }
  0x1e   : > { %p39_p2 = scmp.ge.s32.totalorder %s3730_s8, 2  ;;  %p71_p3 = scmp.gt.s32.totalorder %s1735_s12, 0 }
  0x1f   : > { %s1741_s13 = sshll.u32 %s3728_s7, 2  ;;  %p93_p6 = scmp.ne.s32.totalorder %s2269_s23, %s2265_s22 }
  0x20   : > { %s3732_s8 = smov (%p39_p2, %s3730_s8), 0  ;;  %s3734_s12 = smov (!%p71_p3, %s1735_s12), 0 }
  0x21   : > { %3641 = sst [smem:[#allocation28_spill]] %s3732_s8  ;;  %s2433_s14 = ssub.s32 %s2297_s30, %s3732_s8 }
  0x22   : > { %s1742_s15 = sadd.s32 4294967295, %s1741_s13  ;;  %s2436_s16 = sor.u32 %s42_s11, %s2433_s14 }
  0x23   : > { %p77_p4 = scmp.gt.s32.totalorder %s1742_s15, 0  ;;  %p99_p7 = scmp.ne.s32.totalorder %s2265_s22, %s2261_s21 }
  0x24   : > { %p2445_p8 = por %p93_p6, %p3603_p1  ;;  %s2449_s8 = sadd.s32 4, %s1734_s9 }
  0x25   : > { %s3736_s15 = smov (!%p77_p4, %s1742_s15), 0  ;;  %3643 = sst [smem:[#allocation29_spill]] %s2449_s8 }
  0x26   : > { %s82_s7 = ssub.s32 %s3734_s12, %s3736_s15  ;;  %s2451_s5 = sadd.s32 4, %s1741_s13 }
  0x27   : > { %3644 = sst [smem:[#allocation30_spill]] %s2451_s5  ;;  %s83_s11 = sor.u32 %s82_s7, %s2433_s14 }
  0x28   : > { %p84_p9 = scmp.eq.s32.totalorder %s83_s11, 0  ;;  %p3602_p10 = scmp.lt.s32.totalorder %s2301_s6, 8 }
  0x29   : > { %s2459_s4 = sshll.u32 %s2297_s30, 5  ;;  %s272_s27 = sand.u32 1, %s2301_s6  }
  0x2a   : > { %s2456_s28 = scalar_select %p84_p9, %s2269_s23, %s86_s10  }
  0x2b   : > { %s274_s2 = sand.u32 1, %s2269_s23   ;;  %s1775_s19 = sshll.u32 %s3734_s12, 1 }
  0x2c   : > { %3645 = sst [smem:[#allocation31_spill]] %s2456_s28  ;;  %s1767_s18 = sshll.u32 %s274_s2, 4 }
  0x2d   : > { %s288_s20 = sadd.s32 %s1775_s19, %s2459_s4  ;;  %s276_s8 = scalar_lea.vmem [#allocation7], %s1767_s18 }
  0x2e   : > { %s1777_s9 = sshll.u32 %s288_s20, 7  ;;  %s291_s15 = sshll.u32 %s276_s8, 4  ;;  %s2469_s15 = int_to_ptr.vmem [resolvable:$true] %s291_s15 }
  0x2f   : > { %s3646_s1 = sld [smem:[#allocation40_spill]]  ;;  %p2475_p11 = pnand %p3602_p10, %p2445_p8 }
  0x30   : > { %s2479_s18 = scalar_lea.sflag [#allocation8], %s272_s27 }
  0x31   : > { %p2027_p13 = pneg %p2475_p11 }
  0x35   : > { %s2467_s0 = scalar_lea.hbm %s3646_s1, %s1777_s9  ;;  %s2030_s7 = scalar_lea.hbm %s3646_s1, 8192 }
  0x36   : > { %s2025_s19 = scalar_lea.hbm %s2467_s0, 256  ;;  %p2031_p3 = scmp.lt.u32.totalorder %s2467_s0, %s3646_s1 }
  0x37   : > { %p2026_p12 = scmp.ne.s32.totalorder %s2467_s0, %s2025_s19  ;;  %p2032_p4 = scmp.lt.u32.totalorder %s2030_s7, %s2025_s19 }
  0x38   : > { %p2034_p8 = scmp.lt.u32.totalorder %s2025_s19, %s2467_s0 }
  0x39   : > { %p2028_p0 = pnand %p2027_p13, %p2026_p12  ;;  %p2033_p6 = por %p2032_p4, %p2031_p3 }
  0x3b   : > { %p2029_p2 = pneg %p2028_p0  ;;  %p2035_p9 = por %p2034_p8, %p2033_p6 }
  0x3d   : > { %p2036_p10 = pnand %p2035_p9, %p2029_p2 }
  0x3f   : > { %2039 = shalt.err (!%p2036_p10)
}
  0x40   : > { %s2040_s27 = scalar_lea.vmem %s2469_s15, 256  ;;  %s2303_s12 = smov [#allocation7]  }
  0x41   : > { %p2041_p12 = scmp.ne.s32.totalorder %s2469_s15, %s2040_s27  ;;  %s2045_s17 = sshll.u32 %s2303_s12, 4  ;;  %s2046_s17 = int_to_ptr.vmem [resolvable:$false] %s2045_s17 }
  0x42   : > { %s2047_s11 = scalar_lea.vmem %s2046_s17, 512  ;;  %p2048_p5 = scmp.lt.s32.totalorder %s2469_s15, %s2046_s17 }
  0x43   : > { %p2043_p0 = pnand %p2041_p12, %p2027_p13  ;;  %p2049_p3 = scmp.lt.s32.totalorder %s2047_s11, %s2040_s27 }
  0x45   : > { %p2044_p1 = pneg %p2043_p0  ;;  %p2050_p4 = por %p2049_p3, %p2048_p5 }
  0x47   : > { %p2051_p6 = pnand %p2050_p4, %p2044_p1 }
  0x49   : > { %2054 = shalt.err (!%p2051_p6)
}
  0x4a   : > { %s3604_s9 = smov 128   ;;  %s3609_s13 = smov 8  }
  0x4b   : > { %1874 = dma.hbm_to_vmem [thread:$0]  (!%p2475_p11), %s2467_s0, 256, %s2469_s15, %s2479_s18, %s3604_s9, %s3604_s9, %s3609_s13  }
  0x4c   : > { %s2511_s19 = sadd.s32 4294967295, %s2301_s6   ;;  %p1760_p1 = scmp.ge.s32.totalorder %s2301_s6, 1 }
  0x4d   : > { %p3606_p5 = scmp.eq.s32.totalorder %s2511_s19, 0  ;;  %p220_p13 = scmp.lt.s32.totalorder %s2301_s6, 9 }
  0x4e   : > { %s2306_s0 = smov [#allocation10]   ;;  %s1733_s21 = sadd.s32 4294967294, %s2301_s6  }
  0x4f   : > { %p2522_p2 = por %p99_p7, %p3606_p5  ;;  %p2526_p8 = pnand %p1760_p1, %p220_p13 }
  0x50   : > { %s232_s15 = sshll.u32 %s2306_s0, 4  ;;  %s46_s7 = sadd.s32 1, %s2281_s26  ;;  %s233_s15 = int_to_ptr.vmem [resolvable:$true] %s232_s15 }
  0x51   : > { %s3648_s5 = scalar_select %p2522_p2, 1, 0 }
  0x52   : > { %s3649_s2 = scalar_select %p2526_p8, 1, 0 }
  0x53   : > { %p1864_p11 = pneg %p2526_p8  ;;  %s3651_s3 = sld [smem:[#allocation42_spill]] }
  0x55   : > { %p2534_p9 = pnand %p1864_p11, %p3606_p5 }
  0x57   : > { %p2057_p12 = pneg %p2534_p9 }
  0x59   : > { %s2055_s27 = scalar_lea.hbm %s3651_s3, 512 }
  0x5a   : > { %p2056_p7 = scmp.ne.s32.totalorder %s3651_s3, %s2055_s27  ;;  %p2062_p4 = scmp.lt.u32.totalorder %s2055_s27, %s3651_s3 }
  0x5c   : > { %p2058_p0 = pnand %p2057_p12, %p2056_p7 }
  0x5e   : > { %p2059_p3 = pneg %p2058_p0 }
  0x60   : > { %p2064_p6 = pnand %p2062_p4, %p2059_p3 }
  0x62   : > { %2067 = shalt.err (!%p2064_p6)
}
  0x63   : > { %s2068_s9 = scalar_lea.vmem %s233_s15, 512  ;;  %p2076_p10 = scmp.lt.s32.totalorder %s233_s15, %s233_s15 }
  0x64   : > { %p2069_p1 = scmp.ne.s32.totalorder %s233_s15, %s2068_s9  ;;  %p2077_p5 = scmp.lt.s32.totalorder %s2068_s9, %s2068_s9 }
  0x66   : > { %p2071_p13 = pnand %p2069_p1, %p2057_p12  ;;  %p2078_p2 = por %p2077_p5, %p2076_p10 }
  0x68   : > { %p2072_p11 = pneg %p2071_p13 }
  0x6a   : > { %p2079_p8 = pnand %p2078_p2, %p2072_p11 }
  0x6c   : > { %2082 = shalt.err (!%p2079_p8)
}
  0x6d   : > { %s3652_s8 = smov 128   ;;  %p3653_p5 = scmp.eq.s32.totalorder %s2436_s16, 0 }
  0x6e   : > { %1867 = dma.hbm_to_vmem [thread:$0]  (!%p2534_p9), %s3651_s3, 512, %s233_s15, [#allocation11], %s3652_s8, %s3652_s8, %s3609_s13  }
  0x6f   : > { %s2562_s9 = scalar_select %p3653_p5, %s2281_s26, %s46_s7  }
  0x70   : > { %p53_p10 = scmp.ne.s32.totalorder %s2281_s26, %s2277_s25  ;;  %p59_p2 = scmp.ne.s32.totalorder %s2277_s25, %s2273_s24 }
  0x71   : > { %3654 = sst [smem:[#allocation32_spill]] %s2562_s9  ;;  %p213_p8 = scmp.eq.s32.totalorder %s1733_s21, 7 }
  0x72   : > { %s249_s20 = sand.u32 1, %s2281_s26   ;;  %p3655_p7 = scmp.eq.s32.totalorder %s2301_s6, 0 }
  0x73   : > { %p3656_p0 = scmp.eq.s32.totalorder %s2511_s19, 0  ;;  %p3658_p4 = scmp.eq.s32.totalorder %s2511_s19, 7 }
  0x74   : > { %p55_p12 = por %p3655_p7, %p53_p10  ;;  %p2583_p9 = por %p213_p8, %p59_p2 }
  0x75   : > { %p2573_p3 = por %p3656_p0, %p59_p2  ;;  %p2579_p6 = por %p3658_p4, %p53_p10 }
  0x76   : > { %s3660_s16 = scalar_select %p2583_p9, 1, 0 }
  0x77   : > { %s3659_s17 = scalar_select %p2579_p6, 1, 0 }
  0x78   : > { %3661 = sst [smem:[#allocation33_spill]] %s3660_s16  ;;  %s1763_s15 = sshll.u32 %s249_s20, 6 }
  0x79   : > { %s1764_s7 = sshll.u32 %s2293_s29, 3  ;;  %s253_s11 = scalar_lea.vmem [#allocation4], %s1763_s15 }
  0x7a   : > { %s259_s21 = sadd.s32 %s2459_s4, %s1764_s7  ;;  %s262_s0 = sshll.u32 %s253_s11, 4  ;;  %s2589_s0 = int_to_ptr.vmem [resolvable:$true] %s262_s0 }
  0x7b   : > { %s1766_s10 = sshll.u32 %s259_s21, 7  ;;  %s3662_s1 = sld [smem:[#allocation39_spill]] }
  0x7c   : > { %p3663_p1 = scmp.lt.s32.totalorder %s2301_s6, 8  ;;  %s2602_s15 = scalar_lea.sflag [#allocation5], %s249_s20 }
  0x7e   : > { %p2598_p13 = pnand %p3663_p1, %p55_p12 }
  0x80   : > { %p2085_p5 = pneg %p2598_p13 }
  0x81   : > { %s2594_s3 = scalar_lea.hbm %s3662_s1, %s1766_s10  ;;  %s2088_s11 = scalar_lea.hbm %s3662_s1, 8192 }
  0x82   : > { %s2083_s7 = scalar_lea.hbm %s2594_s3, 1024  ;;  %p2089_p8 = scmp.lt.u32.totalorder %s2594_s3, %s3662_s1 }
  0x83   : > { %p2084_p11 = scmp.ne.s32.totalorder %s2594_s3, %s2083_s7  ;;  %p2090_p7 = scmp.lt.u32.totalorder %s2088_s11, %s2083_s7 }
  0x84   : > { %p2092_p0 = scmp.lt.u32.totalorder %s2083_s7, %s2594_s3 }
  0x85   : > { %p2086_p10 = pnand %p2085_p5, %p2084_p11  ;;  %p2091_p12 = por %p2090_p7, %p2089_p8 }
  0x87   : > { %p2087_p2 = pneg %p2086_p10  ;;  %p2093_p4 = por %p2092_p0, %p2091_p12 }
  0x89   : > { %p2094_p1 = pnand %p2093_p4, %p2087_p2 }
  0x8b   : > { %2097 = shalt.err (!%p2094_p1)
}
  0x8c   : > { %s2098_s20 = scalar_lea.vmem %s2589_s0, 1024  ;;  %s2307_s13 = smov [#allocation4]  }
  0x8d   : > { %p2099_p11 = scmp.ne.s32.totalorder %s2589_s0, %s2098_s20  ;;  %s2103_s21 = sshll.u32 %s2307_s13, 4  ;;  %s2104_s21 = int_to_ptr.vmem [resolvable:$false] %s2103_s21 }
  0x8e   : > { %s2105_s10 = scalar_lea.vmem %s2104_s21, 2048  ;;  %p2106_p6 = scmp.lt.s32.totalorder %s2589_s0, %s2104_s21 }
  0x8f   : > { %p2101_p10 = pnand %p2099_p11, %p2085_p5  ;;  %p2107_p8 = scmp.lt.s32.totalorder %s2105_s10, %s2098_s20 }
  0x91   : > { %p2102_p9 = pneg %p2101_p10  ;;  %p2108_p7 = por %p2107_p8, %p2106_p6 }
  0x93   : > { %p2109_p12 = pnand %p2108_p7, %p2102_p9 }
  0x95   : > { %2112 = shalt.err (!%p2109_p12)
}
  0x96   : > { %s3665_s7 = smov 8   ;;  %s3666_s11 = sld [smem:[#allocation29_spill]] }
  0x97   : > { %s3667_s12 = sld [smem:[#allocation30_spill]]  ;;  %s3668_s1 = sld [smem:[#allocation20_spill]] }
  0x98   : > { %s3669_s13 = sld [smem:[#allocation19_spill]]  ;;  %s3670_s29 = sld [smem:[#allocation18_spill]] }
  0x99   : > { %1871 = dma.hbm_to_vmem [thread:$0]  (!%p2598_p13), %s2594_s3, 1024, %s2589_s0, %s2602_s15, %s3652_s8, %s3652_s8, %s3665_s7  }
  0x9a   : > { %p3671_p0 = scmp.eq.s32.totalorder %s2301_s6, 0  ;;  %p3673_p1 = scmp.eq.s32.totalorder %s2511_s19, 0 }
  0x9b   : > { %p3675_p10 = scmp.lt.s32.totalorder %s2301_s6, 8 }
  0x9c   : > { %p1749_p6 = scmp.lt.s32.totalorder %s3666_s11, 15 }
  0x9d   : > { %p1755_p9 = scmp.lt.s32.totalorder %s3667_s12, 15  ;;  %s126_s30 = sadd.s32 1, %s3668_s1 }
  0x9e   : > { %s3738_s11 = smov (!%p1749_p6, %s3666_s11), 15  ;;  %p133_p5 = scmp.ne.s32.totalorder %s3668_s1, %s3669_s13 }
  0x9f   : > { %p139_p2 = scmp.ne.s32.totalorder %s3669_s13, %s3670_s29  ;;  %s3740_s12 = smov (!%p1755_p9, %s3667_s12), 15 }
  0xa0   : > { %p2644_p4 = por %p133_p5, %p3671_p0  ;;  %s122_s3 = ssub.s32 %s3738_s11, %s3740_s12 }
  0xa1   : > { %p2650_p11 = por %p139_p2, %p3673_p1  ;;  %s303_s0 = sand.u32 1, %s3668_s1  }
  0xa2   : > { %s123_s15 = sor.u32 %s122_s3, %s2433_s14  ;;  %s1778_s10 = sshll.u32 %s303_s0, 4 }
  0xa3   : > { %s3674_s21 = scalar_select %p2650_p11, 1, 0 }
  0xa4   : > { %p124_p13 = scmp.eq.s32.totalorder %s123_s15, 0  ;;  %s1785_s9 = sshll.u32 %s3738_s11, 1 }
  0xa5   : > { %s305_s29 = scalar_lea.vmem [#allocation9], %s1778_s10  ;;  %s317_s26 = sadd.s32 %s1785_s9, %s2459_s4 }
  0xa6   : > { %s320_s13 = sshll.u32 %s305_s29, 4  ;;  %s3742_s1 = smov (!%p124_p13, %s3668_s1), %s126_s30  ;;  %s2660_s13 = int_to_ptr.vmem [resolvable:$true] %s320_s13 }
  0xa7   : > { %s1787_s28 = sshll.u32 %s317_s26, 7  ;;  %p2666_p8 = pnand %p3675_p10, %p2644_p4 }
  0xa8   : > { %s3677_s14 = sld [smem:[#allocation41_spill]] }
  0xa9   : > { %p2115_p12 = pneg %p2666_p8 }
  0xae   : > { %s2673_s11 = scalar_lea.hbm %s3677_s14, %s1787_s28  ;;  %s2118_s16 = scalar_lea.hbm %s3677_s14, 8192 }
  0xaf   : > { %s2113_s4 = scalar_lea.hbm %s2673_s11, 256  ;;  %p2119_p5 = scmp.lt.u32.totalorder %s2673_s11, %s3677_s14 }
  0xb0   : > { %p2114_p7 = scmp.ne.s32.totalorder %s2673_s11, %s2113_s4  ;;  %p2120_p2 = scmp.lt.u32.totalorder %s2118_s16, %s2113_s4 }
  0xb1   : > { %p2122_p4 = scmp.lt.u32.totalorder %s2113_s4, %s2673_s11 }
  0xb2   : > { %p2116_p6 = pnand %p2115_p12, %p2114_p7  ;;  %p2121_p0 = por %p2120_p2, %p2119_p5 }
  0xb4   : > { %p2117_p9 = pneg %p2116_p6  ;;  %p2123_p1 = por %p2122_p4, %p2121_p0 }
  0xb6   : > { %p2124_p13 = pnand %p2123_p1, %p2117_p9 }
  0xb8   : > { %2127 = shalt.err (!%p2124_p13)
}
  0xb9   : > { %s2128_s28 = scalar_lea.vmem %s2660_s13, 256  ;;  %s2308_s3 = smov [#allocation9]  }
  0xba   : > { %p2129_p10 = scmp.ne.s32.totalorder %s2660_s13, %s2128_s28  ;;  %s2133_s0 = sshll.u32 %s2308_s3, 4  ;;  %s2134_s0 = int_to_ptr.vmem [resolvable:$false] %s2133_s0 }
  0xbb   : > { %s2135_s15 = scalar_lea.vmem %s2134_s0, 512  ;;  %p2136_p11 = scmp.lt.s32.totalorder %s2660_s13, %s2134_s0 }
  0xbc   : > { %p2131_p7 = pnand %p2129_p10, %p2115_p12  ;;  %p2137_p5 = scmp.lt.s32.totalorder %s2135_s15, %s2128_s28 }
  0xbe   : > { %p2132_p6 = pneg %p2131_p7  ;;  %p2138_p2 = por %p2137_p5, %p2136_p11 }
  0xc0   : > { %p2139_p0 = pnand %p2138_p2, %p2132_p6 }
  0xc2   : > { %2142 = shalt.err (!%p2139_p0)
}
  0xc3   : > { %1877 = dma.hbm_to_vmem [thread:$0]  (!%p2666_p8), %s2673_s11, 256, %s2660_s13, %s2479_s18, %s3652_s8, %s3652_s8, %s3665_s7  }
  0xc4   : > { %p3678_p12 = scmp.ne.s32.totalorder %s3649_s2, 0 }
  0xc6   : > { %332 = sbr.rel (%p3678_p12) target bundleno = 634 (0x27a), region = 40 }
  0xcd   : > { %s2707_s10 = sand.u32 1, %s2277_s25  }
  0xce   : > { %s1789_s29 = sshll.u32 %s2707_s10, 6  ;;  %s335_s12 = scalar_lea.sflag [#allocation5], %s2707_s10 }
  0xcf   : > { %s2713_s23 = scalar_lea.vmem [#allocation4], %s1789_s29 }
  0xd0   : > { %2228 = dma.done.wait (%p2573_p3), %s335_s12, 1024  }
  0xd1   : > { %2230 = vsyncadd (%p2573_p3), %s335_s12, 4294966272  ;;  %s343_s18 = sand.u32 1, %s2511_s19   ;;  %s345_s2 = sand.u32 1, %s2265_s22  }
  0xd2   : > { %s2721_s8 = sshll.u32 %s345_s2, 4  ;;  %s344_s7 = scalar_lea.sflag [#allocation8], %s343_s18 }
  0xd3   : > { %s347_s13 = scalar_lea.vmem [#allocation7], %s2721_s8  ;;  %p3679_p11 = scmp.ne.s32.totalorder %s3648_s5, 0 }
  0xd5   : > { %2232 = dma.done.wait (%p3679_p11), %s344_s7, 256  }
  0xd6   : > { %2234 = vsyncadd (%p3679_p11), %s344_s7, 4294967040  ;;  %s3680_s11 = sld [smem:[#allocation19_spill]]  ;;  %p3681_p3 = scmp.ne.s32.totalorder %s3674_s21, 0 }
  0xdc   : > { %s354_s4 = sand.u32 1, %s3680_s11  }
  0xdd   : > { %s2729_s27 = sshll.u32 %s354_s4, 4 }
  0xde   : > { %s356_s26 = scalar_lea.vmem [#allocation9], %s2729_s27 }
  0xdf   : > { %2236 = dma.done.wait (%p3681_p3), %s344_s7, 256  }
  0xe0   : > { %2238 = vsyncadd (%p3681_p3), %s344_s7, 4294967040  ;;  %p3682_p8 = scmp.eq.s32.totalorder %s2511_s19, 0 }
  0xe2   : > { %2240 = dma.done.wait (%p3682_p8), [#allocation11], 512   ;;  %p3683_p9 = pmov %p3682_p8 }
  0xe3   : > { %v2309_v0 = vmov 0.0   ;;  %v437_v1 = vld [vmem:[%s2713_s23] sm:$0xff]  ;;  %v438_v2 = vld [vmem:[%s2713_s23 + $0x8] sm:$0xff]  ;;  %v439_v3 = vld [vmem:[%s2713_s23 + $0x10] sm:$0xff]  ;;  %s2750_s19 = scalar_lea.vmem [#allocation12], %s1789_s29  ;;  %s3684_s5 = sld [smem:[#allocation23_spill]] }
  0xe4   : > { %2242 = vsyncadd (%p3683_p9), [#allocation11], 4294966784  ;;  %413 = vst [vmem:[#allocation2] sm:$0x1] %v2309_v0  ;;  %v440_v4 = vld [vmem:[%s2713_s23 + $0x18] sm:$0xff]  ;;  %v441_v5 = vld [vmem:[%s2713_s23 + $0x20] sm:$0xff] }
  0xe5   : > { %414 = vst [vmem:[#allocation2 + $0x10] sm:$0x1] %v2309_v0  ;;  %415 = vst [vmem:[#allocation2 + $0x20] sm:$0x1] %v2309_v0  ;;  %v442_v6 = vld [vmem:[%s2713_s23 + $0x28] sm:$0xff]  ;;  %v443_v7 = vld [vmem:[%s2713_s23 + $0x30] sm:$0xff] }
  0xe6   : > { %416 = vst [vmem:[#allocation2 + $0x30] sm:$0x1] %v2309_v0  ;;  %417 = vst [vmem:[#allocation2 + $0x40] sm:$0x1] %v2309_v0  ;;  %v444_v8 = vld [vmem:[%s2713_s23 + $0x38] sm:$0xff] }
  0xe7   : > { %418 = vst [vmem:[#allocation2 + $0x50] sm:$0x1] %v2309_v0  ;;  %419 = vst [vmem:[#allocation2 + $0x60] sm:$0x1] %v2309_v0 }
  0xe8   : > { %420 = vst [vmem:[#allocation2 + $0x70] sm:$0x1] %v2309_v0  ;;  %421 = vst [vmem:[#allocation2 + $0x80] sm:$0x1] %v2309_v0 }
  0xe9   : > { %422 = vst [vmem:[#allocation2 + $0x90] sm:$0x1] %v2309_v0  ;;  %423 = vst [vmem:[#allocation2 + $0xa0] sm:$0x1] %v2309_v0  ;;  %p1794_p4 = scmp.le.s32.totalorder %s3684_s5, 0 }
  0xea   : > { %424 = vst [vmem:[#allocation2 + $0xb0] sm:$0x1] %v2309_v0  ;;  %425 = vst [vmem:[#allocation2 + $0x9] sm:$0x1] %v2309_v0  ;;  %v458_v9 = vld [vmem:[%s347_s13] sm:$0xff] (!%p1794_p4)  ;;  %v459_v10 = vld [vmem:[%s347_s13 + $0x8] sm:$0xff] (!%p1794_p4) }
  0xeb   : > { %426 = vst [vmem:[#allocation2 + $0x19] sm:$0x1] %v2309_v0  ;;  %427 = vst [vmem:[#allocation2 + $0x29] sm:$0x1] %v2309_v0 }
  0xec   : > { %428 = vst [vmem:[#allocation2 + $0x39] sm:$0x1] %v2309_v0  ;;  %429 = vst [vmem:[#allocation2 + $0x49] sm:$0x1] %v2309_v0 }
  0xed   : > { %430 = vst [vmem:[#allocation2 + $0x59] sm:$0x1] %v2309_v0  ;;  %431 = vst [vmem:[#allocation2 + $0x69] sm:$0x1] %v2309_v0 }
  0xee   : > { %432 = vst [vmem:[#allocation2 + $0x79] sm:$0x1] %v2309_v0  ;;  %433 = vst [vmem:[#allocation2 + $0x89] sm:$0x1] %v2309_v0  ;;  %457 = sbr.rel (%p1794_p4) target bundleno = 246 (0xf6), region = 60 }
  0xef   : > { %434 = vst [vmem:[#allocation2 + $0x99] sm:$0x1] %v2309_v0  ;;  %435 = vst [vmem:[#allocation2 + $0xa9] sm:$0x1] %v2309_v0 }
  0xf0   : > { %436 = vst [vmem:[#allocation2 + $0xb9] sm:$0x1] %v2309_v0  ;;  %446 = vst [vmem:[#allocation2 + $0x21] sm:$0xff] %v437_v1 }
  0xf1   : > { %447 = vst [vmem:[#allocation2 + $0x31] sm:$0xff] %v438_v2  ;;  %448 = vst [vmem:[#allocation2 + $0x41] sm:$0xff] %v439_v3 }
  0xf2   : > { %449 = vst [vmem:[#allocation2 + $0x51] sm:$0xff] %v440_v4  ;;  %450 = vst [vmem:[#allocation2 + $0x61] sm:$0xff] %v441_v5 }
  0xf3   : > { %451 = vst [vmem:[#allocation2 + $0x71] sm:$0xff] %v442_v6  ;;  %452 = vst [vmem:[#allocation2 + $0x81] sm:$0xff] %v443_v7 }
  0xf4   : > { %453 = vst [vmem:[#allocation2 + $0x91] sm:$0xff] %v444_v8  ;;  %460 = vst [vmem:[#allocation2 + $0x1] sm:$0xff] (!%p1794_p4), %v458_v9 }
  0xf5   : > { %461 = vst [vmem:[#allocation2 + $0x11] sm:$0xff] %v459_v10 }
  0xf6 PF: > { %s3685_s21 = sld [smem:[#allocation23_spill]] }
  0xfc   : > { %p1795_p1 = scmp.ne.s32.totalorder %s3685_s21, 0 }
  0xfd   : > { %v2310_v11 = vmov (!%p1795_p1), 0.0  }
  0xfe   : > { %465 = sbr.rel (%p1795_p1) target bundleno = 261 (0x105), region = 64  ;;  %466 = vst [vmem:[#allocation2 + $0x1] sm:$0xff] (!%p1795_p1), %v2310_v11  ;;  %467 = vst [vmem:[#allocation2 + $0x11] sm:$0xff] (!%p1795_p1), %v2310_v11 }
 0x105 PF: > { %s3686_s9 = sld [smem:[#allocation23_spill]] }
 0x10b   : > { %p1796_p13 = scmp.ge.s32.totalorder %s3686_s9, 3 }
 0x10c   : > { %v472_v12 = vld [vmem:[%s356_s26] sm:$0xff] (!%p1796_p13)  ;;  %v473_v13 = vld [vmem:[%s356_s26 + $0x8] sm:$0xff] (!%p1796_p13) }
 0x10d   : > { %471 = sbr.rel (%p1796_p13) target bundleno = 276 (0x114), region = 68  ;;  %475 = vst [vmem:[#allocation2 + $0xa1] sm:$0xff] (!%p1796_p13), %v472_v12  ;;  %476 = vst [vmem:[#allocation2 + $0xb1] sm:$0xff] (!%p1796_p13), %v473_v13 }
 0x114 PF: > { %s3687_s16 = sld [smem:[#allocation23_spill]] }
 0x11a   : > { %p1797_p10 = scmp.ne.s32.totalorder %s3687_s16, 3 }
 0x11b   : > { %v2311_v14 = vmov (!%p1797_p10), 0.0  }
 0x11c   : > { %480 = sbr.rel (%p1797_p10) target bundleno = 291 (0x123), region = 72  ;;  %482 = vst [vmem:[#allocation2 + $0xa1] sm:$0xff] (!%p1797_p10), %v2311_v14  ;;  %483 = vst [vmem:[#allocation2 + $0xb1] sm:$0xff] (!%p1797_p10), %v2311_v14 }
 0x123 PF: > { %v488_v15 = vld [vmem:[#allocation2 + $0x20] sm:$0xff]  ;;  %s2312_s30 = smov 64   ;;  %v489_v17 = vld [vmem:[#allocation2 + $0x30] sm:$0xff]  ;;  %s2313_s20 = smov 32   ;;  %v484_v56 = vlaneseq  ;;  %v2942_v12 = vld [vmem:[#allocation10 + $0xa] ss:$0 sm:$0xff] }
 0x124   : > { %v486_v16 = vld [vmem:[#allocation2] sm:$0xff]  ;;  %514 = vrot.lane.b32.xlu1 %v488_v15, %s2312_s30  ;;  %v487_v18 = vld [vmem:[#allocation2 + $0x10] sm:$0xff]  ;;  %s2314_s28 = smov 96   ;;  %s3691_s15 = sld [smem:[#allocation43_spill]] }
 0x125   : > { %510 = vrot.lane.b32.xlu0 %v486_v16, %s2312_s30  ;;  %v491_v19 = vld [vmem:[#allocation2 + $0x50] sm:$0xff]  ;;  %v490_v20 = vld [vmem:[#allocation2 + $0x40] sm:$0xff]  ;;  %v2906_v60 = vand.u32 127, %v484_v56  ;;  %s3705_s29 = sld [smem:[#allocation23_spill]]  ;;  %s3706_s12 = sld [smem:[#allocation24_spill]] }
 0x126   : > { %v493_v21 = vld [vmem:[#allocation2 + $0x70] sm:$0xff]  ;;  %v492_v22 = vld [vmem:[#allocation2 + $0x60] sm:$0xff]  ;;  %s1583_s8 = sshll.u32 %s2750_s19, 4  ;;  %s3707_s4 = sld [smem:[#allocation44_spill]]  ;;  %s3503_s8 = int_to_ptr.vmem [resolvable:$true] %s1583_s8 }
 0x127   : > { %v495_v23 = vld [vmem:[#allocation2 + $0x90] sm:$0xff]  ;;  %v494_v24 = vld [vmem:[#allocation2 + $0x80] sm:$0xff]  ;;  %vm558_vm0 = vcmp.lt.s32.totalorder %v2906_v60, 64  ;;  %vm655_vm1 = vcmp.lt.s32.totalorder %v2906_v60, 32  ;;  %vm778_vm2 = vcmp.lt.s32.totalorder %v2906_v60, 96  ;;  %s1568_s26 = scalar_lea.sflag [#allocation6], %s2707_s10 }
 0x128   : > { %516 = vrot.lane.b32.xlu1 %v489_v17, %s2312_s30  ;;  %v497_v25 = vld [vmem:[#allocation2 + $0xb0] sm:$0xff]  ;;  %v496_v26 = vld [vmem:[#allocation2 + $0xa0] sm:$0xff]  ;;  %s2143_s5 = scalar_lea.vmem %s3503_s8, 1024  ;;  %p3708_p6 = scmp.ne.s32.totalorder %s3659_s17, 0 }
 0x129   : > { %512 = vrot.lane.b32.xlu0 %v487_v18, %s2312_s30  ;;  %v2776_v27 = vld [vmem:[#allocation2 + $0x11] sm:$0xff]  ;;  %v2778_v28 = vld [vmem:[#allocation2 + $0x1] sm:$0xff]  ;;  %v2919_v0 = vld [vmem:[#allocation10] ss:$0 sm:$0xff]  ;;  %p2144_p7 = scmp.ne.s32.totalorder %s3503_s8, %s2143_s5  ;;  %s2315_s21 = smov [#allocation12]  }
 0x12a   : > { %v2784_v29 = vld [vmem:[#allocation2 + $0x31] sm:$0xff]  ;;  %v2786_v30 = vld [vmem:[#allocation2 + $0x21] sm:$0xff]  ;;  %v2928_v5 = vld [vmem:[%s3691_s15] ss:$0 sm:$0xff]  ;;  %s2147_s9 = sshll.u32 %s2315_s21, 4  ;;  %s2148_s9 = int_to_ptr.vmem [resolvable:$false] %s2147_s9 }
 0x12b   : > { %v2792_v31 = vld [vmem:[#allocation2 + $0x51] sm:$0xff]  ;;  %v2794_v32 = vld [vmem:[#allocation2 + $0x41] sm:$0xff]  ;;  %s1829_s23 = sshll.u32 %s3705_s29, 3  ;;  %s1830_s18 = sshll.u32 %s3706_s12, 5 }
 0x12c   : > { %520 = vrot.lane.b32.xlu1 %v491_v19, %s2312_s30  ;;  %3688 = vst [vmem:[#allocation34_spill] sm:$0xff] %v2792_v31  ;;  %v2800_v33 = vld [vmem:[#allocation2 + $0x71] sm:$0xff]  ;;  %v2802_v34 = vld [vmem:[#allocation2 + $0x61] sm:$0xff]  ;;  %s1580_s2 = sadd.s32 %s1830_s18, %s1829_s23  ;;  %p2145_p5 = pnand %p2144_p7, %p3708_p6 }
 0x12d   : > { %518 = vrot.lane.b32.xlu0 %v490_v20, %s2312_s30  ;;  %3689 = vst [vmem:[#allocation35_spill] sm:$0xff] %v2800_v33  ;;  %3690 = vst [vmem:[#allocation36_spill] sm:$0xff] %v2802_v34  ;;  %v2808_v35 = vld [vmem:[#allocation2 + $0x91] sm:$0xff]  ;;  %v2810_v36 = vld [vmem:[#allocation2 + $0x81] sm:$0xff]  ;;  %s1831_s7 = sshll.u32 %s1580_s2, 7  ;;  %s2149_s16 = scalar_lea.vmem %s2148_s9, 2048 }
 0x12e   : > { %v2816_v37 = vld [vmem:[#allocation2 + $0xb1] sm:$0xff]  ;;  %v2818_v38 = vld [vmem:[#allocation2 + $0xa1] sm:$0xff]  ;;  %s3508_s27 = scalar_lea.hbm %s3707_s4, %s1831_s7  ;;  %p2146_p2 = pneg %p2145_p5 }
 0x12f   : > { %v2852_v39 = vld [vmem:[#allocation2 + $0x12] sm:$0xff]  ;;  %v2854_v40 = vld [vmem:[#allocation2 + $0x2] sm:$0xff]  ;;  %p2150_p0 = scmp.lt.s32.totalorder %s3503_s8, %s2148_s9  ;;  %p2151_p12 = scmp.lt.s32.totalorder %s2149_s16, %s2143_s5 }
 0x130   : > { %524 = vrot.lane.b32.xlu1 %v493_v21, %s2312_s30  ;;  %v2860_v41 = vld [vmem:[#allocation2 + $0x32] sm:$0xff]  ;;  %v2862_v42 = vld [vmem:[#allocation2 + $0x22] sm:$0xff] }
 0x131   : > { %522 = vrot.lane.b32.xlu0 %v492_v22, %s2312_s30  ;;  %v2868_v45 = vld [vmem:[#allocation2 + $0x52] sm:$0xff]  ;;  %v2870_v46 = vld [vmem:[#allocation2 + $0x42] sm:$0xff]  ;;  %p2152_p11 = por %p2151_p12, %p2150_p0 }
 0x132   : > { %v2876_v49 = vld [vmem:[#allocation2 + $0x72] sm:$0xff]  ;;  %v2878_v50 = vld [vmem:[#allocation2 + $0x62] sm:$0xff] }
 0x133   : > { %v2886_v53 = vld [vmem:[#allocation2 + $0x82] sm:$0xff]  ;;  %v2896_v57 = vld [vmem:[#allocation2 + $0x92] sm:$0xff]  ;;  %p2153_p3 = pnand %p2152_p11, %p2146_p2 }
 0x134   : > { %528 = vrot.lane.b32.xlu1 %v495_v23, %s2312_s30  ;;  %v2908_v61 = vld [vmem:[#allocation2 + $0xa2] sm:$0xff]  ;;  %v2921_v1 = vld [vmem:[#allocation2 + $0xb2] sm:$0xff] }
 0x135   : > { %526 = vrot.lane.b32.xlu0 %v494_v24, %s2312_s30  ;;  %v2923_v4 = vld [vmem:[#allocation10 + $0x5] ss:$0 sm:$0xff] }
 0x138   : > { %532 = vrot.lane.b32.xlu1 %v497_v25, %s2312_s30 }
 0x139   : > { %530 = vrot.lane.b32.xlu0 %v496_v26, %s2312_s30 }
 0x13c   : > { %536 = vrot.lane.b32.xlu1 %v2776_v27, %s2312_s30 }
 0x13d   : > { %534 = vrot.lane.b32.xlu0 %v2778_v28, %s2312_s30 }
 0x140   : > { %540 = vrot.lane.b32.xlu1 %v2784_v29, %s2312_s30 }
 0x141   : > { %538 = vrot.lane.b32.xlu0 %v2786_v30, %s2312_s30 }
 0x144   : > { %544 = vrot.lane.b32.xlu1 %v2792_v31, %s2312_s30 }
 0x145   : > { %542 = vrot.lane.b32.xlu0 %v2794_v32, %s2312_s30 }
 0x148   : > { %548 = vrot.lane.b32.xlu1 %v2800_v33, %s2312_s30 }
 0x149   : > { %546 = vrot.lane.b32.xlu0 %v2802_v34, %s2312_s30 }
 0x14c   : > { %552 = vrot.lane.b32.xlu1 %v2808_v35, %s2312_s30 }
 0x14d   : > { %550 = vrot.lane.b32.xlu0 %v2810_v36, %s2312_s30 }
 0x150   : > { %556 = vrot.lane.b32.xlu1 %v2816_v37, %s2312_s30 }
 0x151   : > { %554 = vrot.lane.b32.xlu0 %v2818_v38, %s2312_s30 }
 0x154   : > { %609 = vrot.lane.b32.xlu1 %v487_v18, %s2313_s20 }
 0x155   : > { %607 = vrot.lane.b32.xlu0 %v486_v16, %s2313_s20 }
 0x158   : > { %613 = vrot.lane.b32.xlu1 %v489_v17, %s2313_s20 }
 0x159   : > { %611 = vrot.lane.b32.xlu0 %v488_v15, %s2313_s20  ;;  %v2944_v15 = vld [vmem:[#allocation10 + $0xf] ss:$0 sm:$0xff] }
 0x15c   : > { %617 = vrot.lane.b32.xlu1 %v491_v19, %s2313_s20 }
 0x15d   : > { %615 = vrot.lane.b32.xlu0 %v490_v20, %s2313_s20 }
 0x160   : > { %621 = vrot.lane.b32.xlu1 %v493_v21, %s2313_s20 }
 0x161   : > { %619 = vrot.lane.b32.xlu0 %v492_v22, %s2313_s20 }
 0x164   : > { %625 = vrot.lane.b32.xlu1 %v495_v23, %s2313_s20 }
 0x165   : > { %623 = vrot.lane.b32.xlu0 %v494_v24, %s2313_s20 }
 0x168   : > { %629 = vrot.lane.b32.xlu1 %v497_v25, %s2313_s20 }
 0x169   : > { %627 = vrot.lane.b32.xlu0 %v496_v26, %s2313_s20 }
 0x16c   : > { %633 = vrot.lane.b32.xlu1 %v2776_v27, %s2313_s20 }
 0x16d   : > { %631 = vrot.lane.b32.xlu0 %v2778_v28, %s2313_s20 }
 0x170   : > { %637 = vrot.lane.b32.xlu1 %v2784_v29, %s2313_s20 }
 0x171   : > { %635 = vrot.lane.b32.xlu0 %v2786_v30, %s2313_s20 }
 0x174   : > { %641 = vrot.lane.b32.xlu1 %v2792_v31, %s2313_s20 }
 0x175   : > { %639 = vrot.lane.b32.xlu0 %v2794_v32, %s2313_s20 }
 0x178   : > { %645 = vrot.lane.b32.xlu1 %v2800_v33, %s2313_s20 }
 0x179   : > { %643 = vrot.lane.b32.xlu0 %v2802_v34, %s2313_s20 }
 0x17c   : > { %649 = vrot.lane.b32.xlu1 %v2808_v35, %s2313_s20 }
 0x17d   : > { %647 = vrot.lane.b32.xlu0 %v2810_v36, %s2313_s20 }
 0x180   : > { %653 = vrot.lane.b32.xlu1 %v2816_v37, %s2313_s20 }
 0x181   : > { %651 = vrot.lane.b32.xlu0 %v2818_v38, %s2313_s20 }
 0x184   : > { %732 = vrot.lane.b32.xlu1 %v2776_v27, %s2314_s28 }
 0x185   : > { %730 = vrot.lane.b32.xlu0 %v2778_v28, %s2314_s28 }
 0x188   : > { %736 = vrot.lane.b32.xlu1 %v2784_v29, %s2314_s28 }
 0x189   : > { %734 = vrot.lane.b32.xlu0 %v2786_v30, %s2314_s28 }
 0x18c   : > { %740 = vrot.lane.b32.xlu1 %v2792_v31, %s2314_s28 }
 0x18d   : > { %738 = vrot.lane.b32.xlu0 %v2794_v32, %s2314_s28 }
 0x190   : > { %744 = vrot.lane.b32.xlu1 %v2800_v33, %s2314_s28 }
 0x191   : > { %742 = vrot.lane.b32.xlu0 %v2802_v34, %s2314_s28 }
 0x194   : > { %756 = vrot.lane.b32.xlu1 %v2852_v39, %s2314_s28 }
 0x195   : > { %754 = vrot.lane.b32.xlu0 %v2854_v40, %s2314_s28 }
 0x196   : > { %v515_v43 = vpop.permute.xlu1 %514 }
 0x197   : > { %v511_v44 = vpop.permute.xlu0 %510 }
 0x198   : > { %760 = vrot.lane.b32.xlu1 %v2860_v41, %s2314_s28 }
 0x199   : > { %758 = vrot.lane.b32.xlu0 %v2862_v42, %s2314_s28 }
 0x19a   : > { %v517_v47 = vpop.permute.xlu1 %516 }
 0x19b   : > { %v513_v48 = vpop.permute.xlu0 %512 }
 0x19c   : > { %764 = vrot.lane.b32.xlu1 %v2868_v45, %s2314_s28 }
 0x19d   : > { %762 = vrot.lane.b32.xlu0 %v2870_v46, %s2314_s28 }
 0x19e   : > { %v521_v51 = vpop.permute.xlu1 %520 }
 0x19f   : > { %v2880_v52 = vpop.permute.xlu0 %518 }
 0x1a0   : > { %768 = vrot.lane.b32.xlu1 %v2876_v49, %s2314_s28 }
 0x1a1   : > { %766 = vrot.lane.b32.xlu0 %v2878_v50, %s2314_s28 }
 0x1a2   : > { %v2888_v54 = vpop.permute.xlu1 %524 }
 0x1a3   : > { %v2890_v55 = vpop.permute.xlu0 %522 }
 0x1a4   : > { %770 = vrot.lane.b32.xlu1 %v2886_v53, %s2314_s28 }
 0x1a5   : > { %746 = vrot.lane.b32.xlu0 %v2810_v36, %s2314_s28 }
 0x1a6   : > { %v2898_v58 = vpop.permute.xlu1 %528 }
 0x1a7   : > { %v2900_v59 = vpop.permute.xlu0 %526 }
 0x1a8   : > { %772 = vrot.lane.b32.xlu1 %v2896_v57, %s2314_s28 }
 0x1a9   : > { %748 = vrot.lane.b32.xlu0 %v2808_v35, %s2314_s28 }
 0x1aa   : > { %v2910_v62 = vpop.permute.xlu1 %532 }
 0x1ab   : > { %v2912_v63 = vpop.permute.xlu0 %530 }
 0x1ac   : > { %774 = vrot.lane.b32.xlu1 %v2908_v61, %s2314_s28 }
 0x1ad   : > { %750 = vrot.lane.b32.xlu0 %v2818_v38, %s2314_s28 }
 0x1ae   : > { %v537_v2 = vpop.permute.xlu1 %536 }
 0x1af   : > { %v535_v3 = vpop.permute.xlu0 %534  ;;  %v560_v6 = vsel %vm558_vm0, %v513_v48, %v537_v2  ;;  %v2963_v2 = vld [vmem:[#allocation10 + $0x14] ss:$0 sm:$0xff] }
 0x1b0   : > { %v559_v7 = vsel %vm558_vm0, %v511_v44, %v535_v3  ;;  %v946_v8 = vmul.f32 %v2919_v0, %v560_v6  ;;  %776 = vrot.lane.b32.xlu1 %v2921_v1, %s2314_s28  ;;  %v957_v10 = vmul.f32 %v2923_v4, %v560_v6 }
 0x1b1   : > { %v945_v9 = vmul.f32 %v2919_v0, %v559_v7  ;;  %752 = vrot.lane.b32.xlu0 %v2816_v37, %s2314_s28 }
 0x1b2   : > { %v541_v13 = vpop.permute.xlu1 %540  ;;  %v950_v18 = vadd.f32 %v2928_v5, %v946_v8 }
 0x1b3   : > { %v949_v11 = vadd.f32 %v2928_v5, %v945_v9  ;;  %v539_v14 = vpop.permute.xlu0 %538  ;;  %v562_v16 = vsel %vm558_vm0, %v517_v47, %v541_v13 }
 0x1b4   : > { %v561_v17 = vsel %vm558_vm0, %v515_v43, %v539_v14  ;;  %830 = vrot.lane.b32.xlu1 %v2776_v27, %s2312_s30  ;;  %v948_v20 = vmul.f32 %v2919_v0, %v562_v16  ;;  %v959_v24 = vmul.f32 %v2923_v4, %v562_v16  ;;  %v970_v25 = vmul.f32 %v2942_v12, %v562_v16 }
 0x1b5   : > { %v961_v19 = vadd.f32 %v957_v10, %v949_v11  ;;  %v947_v21 = vmul.f32 %v2919_v0, %v561_v17  ;;  %v958_v22 = vmul.f32 %v2923_v4, %v561_v17  ;;  %v969_v23 = vmul.f32 %v2942_v12, %v561_v17  ;;  %828 = vrot.lane.b32.xlu0 %v2778_v28, %s2312_s30 }
 0x1b6   : > { %v981_v26 = vmul.f32 %v2944_v15, %v562_v16  ;;  %v545_v43 = vpop.permute.xlu1 %544  ;;  %v952_v7 = vadd.f32 %v2928_v5, %v948_v20 }
 0x1b7   : > { %v543_v44 = vpop.permute.xlu0 %542  ;;  %v951_v47 = vadd.f32 %v2928_v5, %v947_v21  ;;  %v962_v48 = vadd.f32 %v958_v22, %v950_v18  ;;  %v973_v56 = vadd.f32 %v969_v23, %v961_v19  ;;  %v564_v3 = vsel %vm558_vm0, %v521_v51, %v545_v43 }
 0x1b8   : > { %v1307_v6 = vmul.f32 %v2919_v0, %v564_v3  ;;  %834 = vrot.lane.b32.xlu1 %v2784_v29, %s2312_s30  ;;  %v972_v11 = vmul.f32 %v2942_v12, %v564_v3  ;;  %v2979_v13 = vmul.f32 %v2944_v15, %v564_v3  ;;  %v2982_v51 = vmul.f32 %v2963_v2, %v564_v3 }
 0x1b9   : > { %v963_v8 = vadd.f32 %v959_v24, %v951_v47  ;;  %v2971_v9 = vadd.f32 %v970_v25, %v962_v48  ;;  %v2973_v10 = vadd.f32 %v981_v26, %v973_v56  ;;  %832 = vrot.lane.b32.xlu0 %v2786_v30, %s2312_s30  ;;  %v563_v14 = vsel %vm558_vm0, %v2880_v52, %v543_v44 }
 0x1ba   : > { %v549_v16 = vpop.permute.xlu1 %548  ;;  %v1311_v18 = vadd.f32 %v2928_v5, %v1307_v6  ;;  %v1314_v19 = vmul.f32 %v2923_v4, %v564_v3  ;;  %v960_v20 = vmul.f32 %v2923_v4, %v563_v14  ;;  %v971_v21 = vmul.f32 %v2942_v12, %v563_v14 }
 0x1bb   : > { %v547_v17 = vpop.permute.xlu0 %546  ;;  %v982_v22 = vmul.f32 %v2944_v15, %v563_v14  ;;  %v1306_v23 = vmul.f32 %v2919_v0, %v563_v14  ;;  %v566_v24 = vsel %vm558_vm0, %v2888_v54, %v549_v16  ;;  %v993_v43 = vmul.f32 %v2963_v2, %v563_v14 }
 0x1bc   : > { %v565_v52 = vsel %vm558_vm0, %v2890_v55, %v547_v17  ;;  %838 = vrot.lane.b32.xlu1 %v2792_v31, %s2312_s30  ;;  %v964_v25 = vadd.f32 %v960_v20, %v952_v7  ;;  %v975_v26 = vadd.f32 %v971_v21, %v963_v8  ;;  %v996_v44 = vmul.f32 %v2963_v2, %v566_v24 }
 0x1bd   : > { %836 = vrot.lane.b32.xlu0 %v2794_v32, %s2312_s30  ;;  %v1310_v47 = vadd.f32 %v2928_v5, %v1306_v23  ;;  %v1309_v54 = vmul.f32 %v2919_v0, %v566_v24  ;;  %v1316_v48 = vmul.f32 %v2923_v4, %v566_v24  ;;  %v1323_v55 = vmul.f32 %v2942_v12, %v566_v24 }
 0x1be   : > { %v553_v56 = vpop.permute.xlu1 %552  ;;  %v1330_v6 = vmul.f32 %v2944_v15, %v566_v24  ;;  %v976_v7 = vadd.f32 %v972_v11, %v964_v25  ;;  %v984_v8 = vmul.f32 %v2944_v15, %v565_v52  ;;  %v1308_v14 = vmul.f32 %v2919_v0, %v565_v52 }
 0x1bf   : > { %v551_v3 = vpop.permute.xlu0 %550  ;;  %v1315_v16 = vmul.f32 %v2923_v4, %v565_v52  ;;  %v1318_v17 = vadd.f32 %v1314_v19, %v1310_v47  ;;  %v1322_v20 = vmul.f32 %v2942_v12, %v565_v52  ;;  %v568_v21 = vsel %vm558_vm0, %v2898_v58, %v553_v56 }
 0x1c0   : > { %842 = vrot.lane.b32.xlu1 %v2800_v33, %s2312_s30  ;;  %v988_v23 = vadd.f32 %v984_v8, %v976_v7  ;;  %v995_v24 = vmul.f32 %v2963_v2, %v565_v52  ;;  %v1312_v11 = vadd.f32 %v2928_v5, %v1308_v14  ;;  %v1325_v25 = vmul.f32 %v2942_v12, %v568_v21 }
 0x1c1   : > { %840 = vrot.lane.b32.xlu0 %v2802_v34, %s2312_s30  ;;  %v1319_v0 = vadd.f32 %v1315_v16, %v1311_v18  ;;  %v1326_v19 = vadd.f32 %v1322_v20, %v1318_v17  ;;  %v1332_v47 = vmul.f32 %v2944_v15, %v568_v21  ;;  %v567_v58 = vsel %vm558_vm0, %v2900_v59, %v551_v3 }
 0x1c2   : > { %v557_v56 = vpop.permute.xlu1 %556  ;;  %v1313_v7 = vadd.f32 %v2928_v5, %v1309_v54  ;;  %v1317_v52 = vmul.f32 %v2923_v4, %v567_v58  ;;  %v1320_v8 = vadd.f32 %v1316_v48, %v1312_v11  ;;  %v1324_v14 = vmul.f32 %v2942_v12, %v567_v58 }
 0x1c3   : > { %v555_v33 = vpop.permute.xlu0 %554  ;;  %v1327_v31 = vadd.f32 %v1323_v55, %v1319_v0  ;;  %v1331_v34 = vmul.f32 %v2944_v15, %v567_v58  ;;  %v1334_v18 = vadd.f32 %v1330_v6, %v1326_v19  ;;  %v1338_v16 = vmul.f32 %v2963_v2, %v567_v58 }
 0x1c4   : > { %854 = vrot.lane.b32.xlu1 %v2852_v39, %s2312_s30  ;;  %v1321_v17 = vadd.f32 %v1317_v52, %v1313_v7  ;;  %v1328_v59 = vadd.f32 %v1324_v14, %v1320_v8  ;;  %v570_v5 = vsel %vm558_vm0, %v2910_v62, %v557_v56  ;;  %v569_v4 = vsel %vm558_vm0, %v2912_v63, %v555_v33  ;;  %v3113_v7 = vld [vmem:[#allocation10 + $0x10] ss:$0 sm:$0xff] }
 0x1c5   : > { %852 = vrot.lane.b32.xlu0 %v2854_v40, %s2312_s30  ;;  %v1339_v12 = vmul.f32 %v2963_v2, %v568_v21  ;;  %v1335_v54 = vadd.f32 %v1331_v34, %v1327_v31  ;;  %v3044_v48 = vadd.f32 %v1338_v16, %v1334_v18  ;;  %v1333_v39 = vmul.f32 %v2944_v15, %v569_v4 }
 0x1c6   : > { %v610_v55 = vpop.permute.xlu1 %609  ;;  %v1329_v6 = vadd.f32 %v1325_v25, %v1321_v17  ;;  %v1336_v20 = vadd.f32 %v1332_v47, %v1328_v59  ;;  %v1340_v62 = vmul.f32 %v2963_v2, %v569_v4  ;;  %v986_v11 = vadd.f32 %v982_v22, %v2971_v9  ;;  %v3111_v47 = vld [vmem:[#allocation10 + $0xb] ss:$0 sm:$0xff] }
 0x1c7   : > { %v608_v3 = vpop.permute.xlu0 %607  ;;  %v3049_v0 = vadd.f32 %v1339_v12, %v1335_v54  ;;  %v997_v33 = vadd.f32 %v993_v43, %v2973_v10  ;;  %v1000_v31 = vadd.f32 %v996_v44, %v988_v23  ;;  %v987_v34 = vadd.f32 %v2979_v13, %v975_v26 }
 0x1c8   : > { %858 = vrot.lane.b32.xlu1 %v2860_v41, %s2312_s30  ;;  %v1341_v40 = vmul.f32 %v2963_v2, %v570_v5  ;;  %v1337_v63 = vadd.f32 %v1333_v39, %v1329_v6  ;;  %v3056_v15 = vadd.f32 %v1340_v62, %v1336_v20  ;;  %v998_v9 = vadd.f32 %v2982_v51, %v986_v11  ;;  %v3128_v20 = vld [vmem:[#allocation10 + $0x15] ss:$0 sm:$0xff] }
 0x1c9   : > { %856 = vrot.lane.b32.xlu0 %v2862_v42, %s2312_s30  ;;  %v999_v25 = vadd.f32 %v995_v24, %v987_v34 }
 0x1ca   : > { %v614_v22 = vpop.permute.xlu1 %613  ;;  %v3061_v19 = vadd.f32 %v1341_v40, %v1337_v63 }
 0x1cb   : > { %v612_v21 = vpop.permute.xlu0 %611 }
 0x1cc   : > { %862 = vrot.lane.b32.xlu1 %v2868_v45, %s2312_s30 }
 0x1cd   : > { %860 = vrot.lane.b32.xlu0 %v2870_v46, %s2312_s30 }
 0x1ce   : > { %v618_v41 = vpop.permute.xlu1 %617 }
 0x1cf   : > { %v616_v2 = vpop.permute.xlu0 %615 }
 0x1d0   : > { %866 = vrot.lane.b32.xlu1 %v2876_v49, %s2312_s30 }
 0x1d1   : > { %864 = vrot.lane.b32.xlu0 %v2878_v50, %s2312_s30 }
 0x1d2   : > { %v3071_v42 = vpop.permute.xlu1 %621 }
 0x1d3   : > { %v3073_v10 = vpop.permute.xlu0 %619 }
 0x1d4   : > { %868 = vrot.lane.b32.xlu1 %v2886_v53, %s2312_s30  ;;  %v3096_v53 = vld [vmem:[#allocation10 + $0x1] ss:$0 sm:$0xff] }
 0x1d5   : > { %844 = vrot.lane.b32.xlu0 %v2810_v36, %s2312_s30 }
 0x1d6   : > { %v3079_v45 = vpop.permute.xlu1 %625 }
 0x1d7   : > { %v3081_v46 = vpop.permute.xlu0 %623 }
 0x1d8   : > { %870 = vrot.lane.b32.xlu1 %v2896_v57, %s2312_s30  ;;  %v3098_v57 = vld [vmem:[#allocation10 + $0x6] ss:$0 sm:$0xff] }
 0x1d9   : > { %846 = vrot.lane.b32.xlu0 %v2808_v35, %s2312_s30 }
 0x1da   : > { %v3087_v49 = vpop.permute.xlu1 %629 }
 0x1db   : > { %v3089_v50 = vpop.permute.xlu0 %627 }
 0x1dc   : > { %872 = vrot.lane.b32.xlu1 %v2908_v61, %s2312_s30 }
 0x1dd   : > { %848 = vrot.lane.b32.xlu0 %v2818_v38, %s2312_s30 }
 0x1de   : > { %v634_v13 = vpop.permute.xlu1 %633 }
 0x1df   : > { %v632_v51 = vpop.permute.xlu0 %631  ;;  %v657_v26 = vsel %vm655_vm1, %v610_v55, %v634_v13 }
 0x1e0   : > { %v656_v43 = vsel %vm655_vm1, %v608_v3, %v632_v51  ;;  %v1014_v44 = vmul.f32 %v3096_v53, %v657_v26  ;;  %874 = vrot.lane.b32.xlu1 %v2921_v1, %s2312_s30  ;;  %v1025_v23 = vmul.f32 %v3098_v57, %v657_v26 }
 0x1e1   : > { %v1013_v61 = vmul.f32 %v3096_v53, %v656_v43  ;;  %850 = vrot.lane.b32.xlu0 %v2816_v37, %s2312_s30 }
 0x1e2   : > { %v1018_v38 = vadd.f32 %v1014_v44, %v998_v9  ;;  %v638_v58 = vpop.permute.xlu1 %637 }
 0x1e3   : > { %v1017_v24 = vadd.f32 %v1013_v61, %v997_v33  ;;  %v636_v56 = vpop.permute.xlu0 %635  ;;  %v659_v52 = vsel %vm655_vm1, %v614_v22, %v638_v58 }
 0x1e4   : > { %v658_v8 = vsel %vm655_vm1, %v612_v21, %v636_v56  ;;  %v1016_v14 = vmul.f32 %v3096_v53, %v659_v52  ;;  %v1027_v59 = vmul.f32 %v3098_v57, %v659_v52  ;;  %v1038_v5 = vmul.f32 %v3111_v47, %v659_v52 }
 0x1e5   : > { %v1029_v1 = vadd.f32 %v1025_v23, %v1017_v24  ;;  %v1015_v37 = vmul.f32 %v3096_v53, %v658_v8  ;;  %v1026_v18 = vmul.f32 %v3098_v57, %v658_v8  ;;  %v1037_v16 = vmul.f32 %v3111_v47, %v658_v8 }
 0x1e6   : > { %v1020_v17 = vadd.f32 %v1016_v14, %v1000_v31  ;;  %v1049_v4 = vmul.f32 %v3113_v7, %v659_v52  ;;  %v642_v12 = vpop.permute.xlu1 %641 }
 0x1e7   : > { %v640_v54 = vpop.permute.xlu0 %639  ;;  %v1019_v39 = vadd.f32 %v1015_v37, %v999_v25  ;;  %v1030_v55 = vadd.f32 %v1026_v18, %v1018_v38  ;;  %v1041_v3 = vadd.f32 %v1037_v16, %v1029_v1  ;;  %v661_v6 = vsel %vm655_vm1, %v618_v41, %v642_v12 }
 0x1e8   : > { %v1356_v62 = vmul.f32 %v3096_v53, %v661_v6  ;;  %v660_v40 = vsel %vm655_vm1, %v616_v2, %v640_v54  ;;  %v1062_v13 = vmul.f32 %v3128_v20, %v661_v6  ;;  %v1040_v38 = vmul.f32 %v3111_v47, %v661_v6 }
 0x1e9   : > { %v1031_v11 = vadd.f32 %v1027_v59, %v1019_v39  ;;  %v1042_v33 = vadd.f32 %v1038_v5, %v1030_v55  ;;  %v1053_v31 = vadd.f32 %v1049_v4, %v1041_v3  ;;  %v1028_v22 = vmul.f32 %v3098_v57, %v660_v40 }
 0x1ea   : > { %v1360_v34 = vadd.f32 %v1356_v62, %v3049_v0  ;;  %v646_v63 = vpop.permute.xlu1 %645  ;;  %v1039_v21 = vmul.f32 %v3111_v47, %v660_v40  ;;  %v1050_v25 = vmul.f32 %v3113_v7, %v660_v40  ;;  %v1061_v41 = vmul.f32 %v3128_v20, %v660_v40 }
 0x1eb   : > { %v644_v9 = vpop.permute.xlu0 %643  ;;  %v1355_v51 = vmul.f32 %v3096_v53, %v660_v40  ;;  %v663_v0 = vsel %vm655_vm1, %v3071_v42, %v646_v63  ;;  %v1032_v26 = vadd.f32 %v1028_v22, %v1020_v17  ;;  %v1051_v23 = vmul.f32 %v3113_v7, %v661_v6 }
 0x1ec   : > { %v662_v2 = vsel %vm655_vm1, %v3073_v10, %v644_v9  ;;  %v1043_v43 = vadd.f32 %v1039_v21, %v1031_v11  ;;  %v1054_v44 = vadd.f32 %v1050_v25, %v1042_v33  ;;  %v3146_v61 = vadd.f32 %v1061_v41, %v1053_v31 }
 0x1ed   : > { %v1359_v24 = vadd.f32 %v1355_v51, %v3044_v48  ;;  %v1363_v52 = vmul.f32 %v3098_v57, %v661_v6  ;;  %v1064_v8 = vmul.f32 %v3128_v20, %v663_v0  ;;  %v1044_v10 = vadd.f32 %v1040_v38, %v1032_v26 }
 0x1ee   : > { %v650_v58 = vpop.permute.xlu1 %649  ;;  %v3152_v42 = vadd.f32 %v1062_v13, %v1054_v44  ;;  %v1052_v1 = vmul.f32 %v3113_v7, %v662_v2  ;;  %v1055_v14 = vadd.f32 %v1051_v23, %v1043_v43  ;;  %v1063_v37 = vmul.f32 %v3128_v20, %v662_v2 }
 0x1ef   : > { %v648_v56 = vpop.permute.xlu0 %647  ;;  %v1358_v18 = vmul.f32 %v3096_v53, %v663_v0  ;;  %v1357_v16 = vmul.f32 %v3096_v53, %v662_v2  ;;  %v1364_v48 = vmul.f32 %v3098_v57, %v662_v2  ;;  %v1367_v17 = vadd.f32 %v1363_v52, %v1359_v24 }
 0x1f0   : > { %v1056_v59 = vadd.f32 %v1052_v1, %v1044_v10  ;;  %v3160_v5 = vadd.f32 %v1063_v37, %v1055_v14  ;;  %v1371_v4 = vmul.f32 %v3111_v47, %v662_v2  ;;  %v665_v12 = vsel %vm655_vm1, %v3079_v45, %v650_v58 }
 0x1f1   : > { %v1365_v55 = vmul.f32 %v3098_v57, %v663_v0  ;;  %v1372_v3 = vmul.f32 %v3111_v47, %v663_v0  ;;  %v1361_v53 = vadd.f32 %v1357_v16, %v3056_v15  ;;  %v1368_v6 = vadd.f32 %v1364_v48, %v1360_v34  ;;  %v1809_v16 = vld [vmem:[#allocation10 + $0x2] ss:$0 sm:$0xff] }
 0x1f2   : > { %v654_v54 = vpop.permute.xlu1 %653  ;;  %v1379_v62 = vmul.f32 %v3113_v7, %v663_v0  ;;  %v3170_v11 = vadd.f32 %v1064_v8, %v1056_v59  ;;  %v1375_v33 = vadd.f32 %v1371_v4, %v1367_v17  ;;  %v1374_v31 = vmul.f32 %v3111_v47, %v665_v12  ;;  %v1810_v59 = vld [vmem:[#allocation10 + $0x7] ss:$0 sm:$0xff] }
 0x1f3   : > { %v652_v39 = vpop.permute.xlu0 %651  ;;  %v664_v45 = vsel %vm655_vm1, %v3081_v46, %v648_v56  ;;  %v1362_v40 = vadd.f32 %v1358_v18, %v3061_v19  ;;  %v1369_v63 = vadd.f32 %v1365_v55, %v1361_v53  ;;  %v1376_v9 = vadd.f32 %v1372_v3, %v1368_v6 }
 0x1f4   : > { %v1381_v22 = vmul.f32 %v3113_v7, %v665_v12  ;;  %v1366_v15 = vmul.f32 %v3098_v57, %v664_v45  ;;  %v1373_v34 = vmul.f32 %v3111_v47, %v664_v45  ;;  %v1380_v21 = vmul.f32 %v3113_v7, %v664_v45 }
 0x1f5   : > { %v1383_v13 = vadd.f32 %v1379_v62, %v1375_v33  ;;  %v1387_v51 = vmul.f32 %v3128_v20, %v664_v45  ;;  %v667_v19 = vsel %vm655_vm1, %v3087_v49, %v654_v54  ;;  %v666_v46 = vsel %vm655_vm1, %v3089_v50, %v652_v39  ;;  %v1811_v39 = vld [vmem:[#allocation10 + $0xc] ss:$0 sm:$0xff] }
 0x1f6   : > { %v3181_v25 = vpop.permute.xlu1 %732  ;;  %v1388_v57 = vmul.f32 %v3128_v20, %v665_v12  ;;  %v1370_v47 = vadd.f32 %v1366_v15, %v1362_v40  ;;  %v1377_v0 = vadd.f32 %v1373_v34, %v1369_v63  ;;  %v1384_v2 = vadd.f32 %v1380_v21, %v1376_v9  ;;  %v1812_v9 = vld [vmem:[#allocation10 + $0x11] ss:$0 sm:$0xff] }
 0x1f7   : > { %v3183_v41 = vpop.permute.xlu0 %730  ;;  %v1391_v26 = vadd.f32 %v1387_v51, %v1383_v13  ;;  %v1382_v43 = vmul.f32 %v3113_v7, %v666_v46  ;;  %v1389_v44 = vmul.f32 %v3128_v20, %v666_v46  ;;  %v1390_v56 = vmul.f32 %v3128_v20, %v667_v19 }
 0x1f8   : > { %v1392_v38 = vadd.f32 %v1388_v57, %v1384_v2  ;;  %v1378_v23 = vadd.f32 %v1374_v31, %v1370_v47  ;;  %v1385_v24 = vadd.f32 %v1381_v22, %v1377_v0  ;;  %v1081_v20 = vmul.f32 %v1809_v16, %v2778_v28  ;;  %v3693_v31 = vld [vmem:[#allocation34_spill] sm:$0xff] }
 0x1f9   : > { %v1093_v55 = vmul.f32 %v1810_v59, %v2776_v27  ;;  %v1082_v3 = vmul.f32 %v1809_v16, %v2776_v27  ;;  %v1083_v53 = vmul.f32 %v1809_v16, %v2786_v30  ;;  %v1084_v6 = vmul.f32 %v1809_v16, %v2784_v29  ;;  %v3695_v27 = vld [vmem:[#allocation35_spill] sm:$0xff] }
 0x1fa   : > { %v3195_v58 = vpop.permute.xlu1 %736  ;;  %v1386_v50 = vadd.f32 %v1382_v43, %v1378_v23  ;;  %v1393_v52 = vadd.f32 %v1389_v44, %v1385_v24  ;;  %v1085_v54 = vadd.f32 %v1081_v20, %v3146_v61  ;;  %v1404_v28 = vmul.f32 %v1809_v16, %v2794_v32  ;;  %v3694_v61 = vld [vmem:[#allocation36_spill] sm:$0xff] }
 0x1fb   : > { %v3197_v49 = vpop.permute.xlu0 %734  ;;  %v1405_v45 = vmul.f32 %v1809_v16, %v3693_v31  ;;  %v1412_v40 = vmul.f32 %v1810_v59, %v3693_v31  ;;  %v1413_v63 = vmul.f32 %v1810_v59, %v3694_v61  ;;  %v1420_v22 = vmul.f32 %v1811_v39, %v3694_v61 }
 0x1fc   : > { %v1394_v8 = vadd.f32 %v1390_v56, %v1386_v50  ;;  %v1421_v15 = vmul.f32 %v1811_v39, %v3695_v27  ;;  %v1094_v34 = vmul.f32 %v1810_v59, %v2786_v30  ;;  %v1105_v21 = vmul.f32 %v1811_v39, %v2786_v30 }
 0x1fd   : > { %v1406_v13 = vmul.f32 %v1809_v16, %v3694_v61  ;;  %v1407_v51 = vmul.f32 %v1809_v16, %v3695_v27  ;;  %v1106_v19 = vmul.f32 %v1811_v39, %v2784_v29  ;;  %v1097_v46 = vadd.f32 %v1093_v55, %v1085_v54  ;;  %v1813_v16 = vld [vmem:[#allocation10 + $0x16] ss:$0 sm:$0xff] }
 0x1fe   : > { %v3200_v10 = vpop.permute.xlu1 %740  ;;  %v1086_v57 = vadd.f32 %v1082_v3, %v3152_v42  ;;  %v1088_v47 = vadd.f32 %v1084_v6, %v3170_v11  ;;  %v1117_v0 = vmul.f32 %v1812_v9, %v2784_v29  ;;  %v1096_v2 = vmul.f32 %v1810_v59, %v2794_v32 }
 0x1ff   : > { %v3202_v1 = vpop.permute.xlu0 %738  ;;  %v1408_v30 = vadd.f32 %v1404_v28, %v1391_v26  ;;  %v1414_v23 = vmul.f32 %v1810_v59, %v3695_v27  ;;  %v1415_v24 = vmul.f32 %v1810_v59, %v2810_v36  ;;  %v1095_v56 = vmul.f32 %v1810_v59, %v2784_v29 }
 0x200   : > { %v1087_v50 = vadd.f32 %v1083_v53, %v3160_v5  ;;  %v1422_v42 = vmul.f32 %v1811_v39, %v2810_v36  ;;  %v1423_v11 = vmul.f32 %v1811_v39, %v2808_v35  ;;  %v1409_v20 = vadd.f32 %v1405_v45, %v1392_v38 }
 0x201   : > { %v1410_v54 = vadd.f32 %v1406_v13, %v1393_v52  ;;  %v1411_v55 = vadd.f32 %v1407_v51, %v1394_v8  ;;  %v1109_v3 = vadd.f32 %v1105_v21, %v1097_v46  ;;  %v1430_v26 = vmul.f32 %v1812_v9, %v2808_v35  ;;  %v3263_v52 = vld [vmem:[#allocation10 + $0x3] ss:$0 sm:$0xff] }
 0x202   : > { %v3204_v14 = vpop.permute.xlu1 %744  ;;  %v1098_v6 = vadd.f32 %v1094_v34, %v1086_v57  ;;  %v1108_v28 = vmul.f32 %v1811_v39, %v3693_v31  ;;  %v1416_v59 = vadd.f32 %v1412_v40, %v1408_v30  ;;  %v1118_v53 = vmul.f32 %v1812_v9, %v2794_v32  ;;  %v691_v57 = vld [vmem:[#allocation2 + $0xa1] sm:$0xff] }
 0x203   : > { %3692 = vst [vmem:[#allocation37_spill] sm:$0xff] %v3204_v14  ;;  %v3206_v7 = vpop.permute.xlu0 %742  ;;  %v1129_v38 = vmul.f32 %v1813_v16, %v2794_v32  ;;  %v1107_v45 = vmul.f32 %v1811_v39, %v2794_v32  ;;  %v1119_v34 = vmul.f32 %v1812_v9, %v3693_v31  ;;  %v1099_v21 = vadd.f32 %v1095_v56, %v1087_v50  ;;  %v692_v56 = vld [vmem:[#allocation2 + $0xb1] sm:$0xff]  ;;  %v3281_v50 = vld [vmem:[#allocation10 + $0x8] ss:$0 sm:$0xff] }
 0x204   : > { %v1417_v13 = vadd.f32 %v1413_v63, %v1409_v20  ;;  %v1418_v51 = vadd.f32 %v1414_v23, %v1410_v54  ;;  %v1419_v40 = vadd.f32 %v1415_v24, %v1411_v55  ;;  %v1121_v46 = vadd.f32 %v1117_v0, %v1109_v3 }
 0x205   : > { %v1428_v39 = vmul.f32 %v1812_v9, %v3695_v27  ;;  %v1429_v63 = vmul.f32 %v1812_v9, %v2810_v36  ;;  %v1431_v0 = vmul.f32 %v1812_v9, %v691_v57  ;;  %v1437_v54 = vmul.f32 %v1813_v16, %v2808_v35 }
 0x206   : > { %v3208_v37 = vpop.permute.xlu1 %756  ;;  %v1426_v23 = vadd.f32 %v1422_v42, %v1418_v51  ;;  %v1133_v24 = vadd.f32 %v1129_v38, %v1121_v46  ;;  %v1439_v3 = vmul.f32 %v1813_v16, %v692_v56 }
 0x207   : > { %v755_v18 = vpop.permute.xlu0 %754 }
 0x208   : > { %v779_v8 = vsel %vm778_vm2, %v3183_v41, %v755_v18  ;;  %v1424_v41 = vadd.f32 %v1420_v22, %v1416_v59  ;;  %v1132_v18 = vmul.f32 %v1813_v16, %v3695_v27  ;;  %v780_v22 = vsel %vm778_vm2, %v3181_v25, %v3208_v37  ;;  %v3307_v59 = vld [vmem:[#allocation10 + $0xd] ss:$0 sm:$0xff] }
 0x209   : > { %v1149_v32 = vmul.f32 %v3263_v52, %v779_v8  ;;  %v1150_v38 = vmul.f32 %v3263_v52, %v780_v22 }
 0x20a   : > { %v3210_v48 = vpop.permute.xlu1 %760  ;;  %v1432_v42 = vadd.f32 %v1428_v39, %v1424_v41 }
 0x20b   : > { %v3212_v17 = vpop.permute.xlu0 %758  ;;  %v782_v25 = vsel %vm778_vm2, %v3195_v58, %v3210_v48 }
 0x20c   : > { %v781_v35 = vsel %vm778_vm2, %v3197_v49, %v3212_v17  ;;  %v1152_v49 = vmul.f32 %v3263_v52, %v782_v25 }
 0x20d   : > { %v1151_v17 = vmul.f32 %v3263_v52, %v781_v35 }
 0x20e   : > { %v3215_v4 = vpop.permute.xlu1 %764 }
 0x20f   : > { %v3217_v12 = vpop.permute.xlu0 %762 }
 0x212   : > { %v3224_v62 = vpop.permute.xlu1 %768 }
 0x213   : > { %v3226_v33 = vpop.permute.xlu0 %766 }
 0x216   : > { %v3243_v43 = vpop.permute.xlu1 %770 }
 0x217   : > { %3696 = vst [vmem:[#allocation34_spill] sm:$0xff] %v3243_v43  ;;  %v3245_v44 = vpop.permute.xlu0 %746  ;;  %v1130_v43 = vmul.f32 %v1813_v16, %v3693_v31  ;;  %v1111_v31 = vadd.f32 %v1107_v45, %v1099_v21  ;;  %v784_v21 = vsel %vm778_vm2, %v3200_v10, %v3215_v4  ;;  %v1174_v10 = vmul.f32 %v3307_v59, %v782_v25 }
 0x218   : > { %3697 = vst [vmem:[#allocation36_spill] sm:$0xff] %v3245_v44  ;;  %v1100_v44 = vadd.f32 %v1096_v2, %v1088_v47  ;;  %v1110_v47 = vadd.f32 %v1106_v19, %v1098_v6  ;;  %v1120_v2 = vmul.f32 %v1812_v9, %v3694_v61  ;;  %v1436_v19 = vmul.f32 %v1813_v16, %v2810_v36 }
 0x219   : > { %v1153_v9 = vadd.f32 %v1149_v32, %v1133_v24  ;;  %v1123_v37 = vadd.f32 %v1119_v34, %v1111_v31  ;;  %v1434_v6 = vadd.f32 %v1430_v26, %v1426_v23  ;;  %v1162_v34 = vmul.f32 %v3281_v50, %v781_v35 }
 0x21a   : > { %v3256_v29 = vpop.permute.xlu1 %772  ;;  %v1112_v30 = vadd.f32 %v1108_v28, %v1100_v44  ;;  %v1425_v44 = vadd.f32 %v1421_v15, %v1417_v13  ;;  %v1122_v20 = vadd.f32 %v1118_v53, %v1110_v47  ;;  %v3296_v15 = vsel %vm778_vm2, %v3202_v1, %v3217_v12 }
 0x21b   : > { %3698 = vst [vmem:[#allocation35_spill] sm:$0xff] %v3256_v29  ;;  %v3258_v5 = vpop.permute.xlu0 %748  ;;  %v1161_v28 = vmul.f32 %v3281_v50, %v780_v22  ;;  %v1453_v58 = vmul.f32 %v3263_v52, %v3296_v15  ;;  %v785_v13 = vsel %vm778_vm2, %v3206_v7, %v3226_v33  ;;  %v1164_v41 = vmul.f32 %v3281_v50, %v3296_v15  ;;  %v3700_v22 = vld [vmem:[#allocation37_spill] sm:$0xff] }
 0x21c   : > { %3699 = vst [vmem:[#allocation38_spill] sm:$0xff] %v3258_v5  ;;  %v1131_v5 = vmul.f32 %v1813_v16, %v3694_v61  ;;  %v1427_v61 = vadd.f32 %v1423_v11, %v1419_v40  ;;  %v1124_v27 = vadd.f32 %v1120_v2, %v1112_v30  ;;  %v1438_v11 = vmul.f32 %v1813_v16, %v691_v57  ;;  %v3328_v2 = vld [vmem:[#allocation10 + $0x12] ss:$0 sm:$0xff] }
 0x21d   : > { %v1433_v1 = vadd.f32 %v1429_v63, %v1425_v44  ;;  %v1134_v53 = vadd.f32 %v1130_v43, %v1122_v20  ;;  %v1165_v45 = vadd.f32 %v1161_v28, %v1153_v9  ;;  %v1440_v16 = vadd.f32 %v1436_v19, %v1432_v42  ;;  %v3340_v19 = vld [vmem:[#allocation10 + $0x17] ss:$0 sm:$0xff] }
 0x21e   : > { %v3272_v29 = vpop.permute.xlu1 %774  ;;  %v1435_v12 = vadd.f32 %v1431_v0, %v1427_v61  ;;  %v1136_v8 = vadd.f32 %v1132_v18, %v1124_v27  ;;  %v1173_v43 = vmul.f32 %v3307_v59, %v781_v35  ;;  %v1135_v51 = vadd.f32 %v1131_v5, %v1123_v37 }
 0x21f   : > { %v3274_v14 = vpop.permute.xlu0 %750  ;;  %v1441_v40 = vadd.f32 %v1437_v54, %v1433_v1  ;;  %v1442_v46 = vadd.f32 %v1438_v11, %v1434_v6  ;;  %v1154_v47 = vadd.f32 %v1150_v38, %v1134_v53  ;;  %v1163_v30 = vmul.f32 %v3281_v50, %v782_v25  ;;  %v3701_v1 = vld [vmem:[#allocation34_spill] sm:$0xff] }
 0x220   : > { %v1443_v57 = vadd.f32 %v1439_v3, %v1435_v12  ;;  %v1457_v32 = vadd.f32 %v1453_v58, %v1440_v16  ;;  %v1155_v4 = vadd.f32 %v1151_v17, %v1135_v51  ;;  %v1454_v7 = vmul.f32 %v3263_v52, %v784_v21 }
 0x221   : > { %v1455_v33 = vmul.f32 %v3263_v52, %v785_v13  ;;  %v1156_v39 = vadd.f32 %v1152_v49, %v1136_v8  ;;  %v1166_v31 = vadd.f32 %v1162_v34, %v1154_v47  ;;  %v1177_v63 = vadd.f32 %v1173_v43, %v1165_v45 }
 0x222   : > { %v3288_v55 = vpop.permute.xlu1 %776  ;;  %v1461_v0 = vmul.f32 %v3281_v50, %v784_v21  ;;  %v1185_v44 = vmul.f32 %v3328_v2, %v782_v25  ;;  %v1176_v23 = vmul.f32 %v3307_v59, %v784_v21  ;;  %v1187_v61 = vmul.f32 %v3328_v2, %v784_v21 }
 0x223   : > { %v3290_v36 = vpop.permute.xlu0 %752  ;;  %v1462_v24 = vmul.f32 %v3281_v50, %v785_v13  ;;  %v1168_v56 = vadd.f32 %v1164_v41, %v1156_v39  ;;  %v786_v20 = vsel %vm778_vm2, %v3700_v22, %v3224_v62  ;;  %v1469_v54 = vmul.f32 %v3307_v59, %v785_v13  ;;  %v3702_v62 = vld [vmem:[#allocation36_spill] sm:$0xff] }
 0x224   : > { %v1465_v27 = vadd.f32 %v1461_v0, %v1457_v32  ;;  %v1167_v42 = vadd.f32 %v1163_v30, %v1155_v4  ;;  %v3355_v11 = vmul.f32 %v3340_v19, %v784_v21  ;;  %v1458_v25 = vadd.f32 %v1454_v7, %v1441_v40  ;;  %v3703_v40 = vld [vmem:[#allocation35_spill] sm:$0xff] }
 0x225   : > { %v1459_v35 = vadd.f32 %v1455_v33, %v1442_v46  ;;  %v1178_v3 = vadd.f32 %v1174_v10, %v1166_v31  ;;  %v1189_v6 = vadd.f32 %v1185_v44, %v1177_v63  ;;  %v1175_v28 = vmul.f32 %v3307_v59, %v3296_v15  ;;  %v3704_v46 = vld [vmem:[#allocation38_spill] sm:$0xff] }
 0x226   : > { %v3312_v48 = vpop.permute.xlu1 %830  ;;  %v787_v12 = vsel %vm778_vm2, %v3702_v62, %v3701_v1  ;;  %v1186_v53 = vmul.f32 %v3328_v2, %v3296_v15  ;;  %v1456_v38 = vmul.f32 %v3263_v52, %v786_v20  ;;  %v1463_v8 = vmul.f32 %v3281_v50, %v786_v20  ;;  %v3389_v44 = vld [vmem:[#allocation10 + $0x4] ss:$0 sm:$0xff] }
 0x227   : > { %v3316_v26 = vpop.permute.xlu0 %828  ;;  %v1466_v58 = vadd.f32 %v1462_v24, %v1458_v25  ;;  %v1470_v45 = vmul.f32 %v3307_v59, %v786_v20  ;;  %v1180_v49 = vadd.f32 %v1176_v23, %v1168_v56  ;;  %v1188_v17 = vmul.f32 %v3328_v2, %v785_v13 }
 0x228   : > { %v1473_v16 = vadd.f32 %v1469_v54, %v1465_v27  ;;  %v1464_v43 = vmul.f32 %v3281_v50, %v787_v12  ;;  %v1467_v21 = vadd.f32 %v1463_v8, %v1459_v35  ;;  %v1471_v51 = vmul.f32 %v3307_v59, %v787_v12 }
 0x229   : > { %v788_v52 = vsel %vm778_vm2, %v3704_v46, %v3703_v40  ;;  %v1179_v30 = vadd.f32 %v1175_v28, %v1167_v42  ;;  %v1197_v41 = vmul.f32 %v3340_v19, %v3296_v15  ;;  %v1200_v32 = vmul.f32 %v3340_v19, %v786_v20 }
 0x22a   : > { %v3333_v18 = vpop.permute.xlu1 %834  ;;  %v1477_v10 = vmul.f32 %v3328_v2, %v786_v20  ;;  %v1199_v50 = vmul.f32 %v3340_v19, %v785_v13  ;;  %v1460_v4 = vadd.f32 %v1456_v38, %v1443_v57  ;;  %v1474_v7 = vadd.f32 %v1470_v45, %v1466_v58  ;;  %v3396_v20 = vld [vmem:[#allocation10 + $0x9] ss:$0 sm:$0xff]  ;;  %v3416_v45 = vld [vmem:[#allocation10 + $0x13] ss:$0 sm:$0xff] }
 0x22b   : > { %v3338_v5 = vpop.permute.xlu0 %832  ;;  %v1478_v33 = vmul.f32 %v3328_v2, %v787_v12  ;;  %v1192_v39 = vadd.f32 %v1188_v17, %v1180_v49  ;;  %v1485_v63 = vmul.f32 %v3340_v19, %v787_v12  ;;  %v1472_v0 = vmul.f32 %v3307_v59, %v788_v52 }
 0x22c   : > { %v1481_v31 = vadd.f32 %v1477_v10, %v1473_v16  ;;  %v1468_v15 = vadd.f32 %v1464_v43, %v1460_v4  ;;  %v1475_v24 = vadd.f32 %v1471_v51, %v1467_v21  ;;  %v1479_v56 = vmul.f32 %v3328_v2, %v788_v52 }
 0x22d   : > { %v1486_v22 = vmul.f32 %v3340_v19, %v788_v52  ;;  %v1190_v27 = vadd.f32 %v1186_v53, %v1178_v3  ;;  %v1191_v54 = vadd.f32 %v1187_v61, %v1179_v30  ;;  %v1482_v42 = vadd.f32 %v1478_v33, %v1474_v7  ;;  %v3408_v61 = vld [vmem:[#allocation10 + $0xe] ss:$0 sm:$0xff] }
 0x22e   : > { %v3352_v9 = vpop.permute.xlu1 %838  ;;  %v789_v25 = vsel %vm778_vm2, %v3274_v14, %v3272_v29  ;;  %v1201_v35 = vadd.f32 %v1197_v41, %v1189_v6  ;;  %v1489_v28 = vadd.f32 %v1485_v63, %v1481_v31  ;;  %v1476_v1 = vadd.f32 %v1472_v0, %v1468_v15 }
 0x22f   : > { %v3357_v37 = vpop.permute.xlu0 %836  ;;  %v1204_v3 = vadd.f32 %v1200_v32, %v1192_v39  ;;  %v1483_v53 = vadd.f32 %v1479_v56, %v1475_v24  ;;  %v1480_v29 = vmul.f32 %v3328_v2, %v789_v25  ;;  %v1487_v6 = vmul.f32 %v3340_v19, %v789_v25  ;;  %v3436_v39 = vld [vmem:[#allocation10 + $0x18] ss:$0 sm:$0xff] }
 0x230   : > { %v1202_v58 = vadd.f32 %v3355_v11, %v1190_v27  ;;  %v1203_v49 = vadd.f32 %v1199_v50, %v1191_v54  ;;  %v790_v17 = vsel %vm778_vm2, %v3290_v36, %v3288_v55  ;;  %v1490_v46 = vadd.f32 %v1486_v22, %v1482_v42 }
 0x231   : > { %v1484_v50 = vadd.f32 %v1480_v29, %v1476_v1  ;;  %v1491_v4 = vadd.f32 %v1487_v6, %v1483_v53  ;;  %v1488_v7 = vmul.f32 %v3340_v19, %v790_v17 }
 0x232   : > { %v3371_v34 = vpop.permute.xlu1 %842 }
 0x233   : > { %v3379_v47 = vpop.permute.xlu0 %840 }
 0x236   : > { %v855_v23 = vpop.permute.xlu1 %854 }
 0x237   : > { %v877_v13 = vsel %vm558_vm0, %v3312_v48, %v855_v23  ;;  %v853_v57 = vpop.permute.xlu0 %852 }
 0x238   : > { %v876_v59 = vsel %vm558_vm0, %v3316_v26, %v853_v57  ;;  %v1218_v62 = vmul.f32 %v3389_v44, %v877_v13  ;;  %v1229_v38 = vmul.f32 %v3396_v20, %v877_v13 }
 0x239   : > { %v1217_v48 = vmul.f32 %v3389_v44, %v876_v59 }
 0x23a   : > { %v859_v12 = vpop.permute.xlu1 %858  ;;  %v1222_v2 = vadd.f32 %v1218_v62, %v1202_v58 }
 0x23b   : > { %v1221_v26 = vadd.f32 %v1217_v48, %v1201_v35  ;;  %v879_v8 = vsel %vm558_vm0, %v3333_v18, %v859_v12  ;;  %v857_v14 = vpop.permute.xlu0 %856 }
 0x23c   : > { %v1220_v43 = vmul.f32 %v3389_v44, %v879_v8  ;;  %v878_v18 = vsel %vm558_vm0, %v3338_v5, %v857_v14  ;;  %v1231_v52 = vmul.f32 %v3396_v20, %v879_v8  ;;  %v1242_v55 = vmul.f32 %v3408_v61, %v879_v8 }
 0x23d   : > { %v1233_v16 = vadd.f32 %v1229_v38, %v1221_v26  ;;  %v1219_v21 = vmul.f32 %v3389_v44, %v878_v18  ;;  %v1230_v11 = vmul.f32 %v3396_v20, %v878_v18  ;;  %v1241_v51 = vmul.f32 %v3408_v61, %v878_v18 }
 0x23e   : > { %v863_v40 = vpop.permute.xlu1 %862  ;;  %v1253_v36 = vmul.f32 %v3416_v45, %v879_v8  ;;  %v1224_v33 = vadd.f32 %v1220_v43, %v1204_v3  ;;  %v1492_v3 = vadd.f32 %v1488_v7, %v1484_v50 }
 0x23f   : > { %v861_v30 = vpop.permute.xlu0 %860  ;;  %v1223_v41 = vadd.f32 %v1219_v21, %v1203_v49  ;;  %v1234_v32 = vadd.f32 %v1230_v11, %v1222_v2  ;;  %v1245_v10 = vadd.f32 %v1241_v51, %v1233_v16  ;;  %v881_v5 = vsel %vm558_vm0, %v3352_v9, %v863_v40 }
 0x240   : > { %v880_v23 = vsel %vm558_vm0, %v3357_v37, %v861_v30  ;;  %v1244_v24 = vmul.f32 %v3408_v61, %v881_v5  ;;  %v1266_v57 = vmul.f32 %v3436_v39, %v881_v5  ;;  %v1503_v22 = vmul.f32 %v3389_v44, %v881_v5 }
 0x241   : > { %v1235_v31 = vadd.f32 %v1231_v52, %v1223_v41  ;;  %v1246_v63 = vadd.f32 %v1242_v55, %v1234_v32  ;;  %v1257_v0 = vadd.f32 %v1253_v36, %v1245_v10  ;;  %v1232_v56 = vmul.f32 %v3396_v20, %v880_v23 }
 0x242   : > { %v867_v15 = vpop.permute.xlu1 %866  ;;  %v1243_v9 = vmul.f32 %v3408_v61, %v880_v23  ;;  %v1254_v13 = vmul.f32 %v3416_v45, %v880_v23  ;;  %v1265_v27 = vmul.f32 %v3436_v39, %v880_v23  ;;  %v1502_v59 = vmul.f32 %v3389_v44, %v880_v23 }
 0x243   : > { %v865_v19 = vpop.permute.xlu0 %864  ;;  %v1236_v54 = vadd.f32 %v1232_v56, %v1224_v33  ;;  %v1255_v35 = vmul.f32 %v3416_v45, %v881_v5  ;;  %v883_v62 = vsel %vm558_vm0, %v3371_v34, %v867_v15  ;;  %v1510_v53 = vmul.f32 %v3396_v20, %v881_v5 }
 0x244   : > { %v1247_v37 = vadd.f32 %v1243_v9, %v1235_v31  ;;  %v1258_v42 = vadd.f32 %v1254_v13, %v1246_v63  ;;  %v882_v25 = vsel %vm558_vm0, %v3379_v47, %v865_v19  ;;  %v1269_v48 = vadd.f32 %v1265_v27, %v1257_v0 }
 0x245   : > { %v1506_v1 = vadd.f32 %v1502_v59, %v1489_v28  ;;  %v1248_v26 = vadd.f32 %v1244_v24, %v1236_v54  ;;  %v1507_v14 = vadd.f32 %v1503_v22, %v1490_v46  ;;  %v1256_v47 = vmul.f32 %v3416_v45, %v882_v25 }
 0x246   : > { %v869_v12 = vpop.permute.xlu1 %868  ;;  %v3457_v38 = vadd.f32 %v1266_v57, %v1258_v42  ;;  %v1277_v29 = vmul.f32 0.70710677, %v1269_v48  ;;  %v1259_v6 = vadd.f32 %v1255_v35, %v1247_v37  ;;  %v1268_v28 = vmul.f32 %v3436_v39, %v883_v62 }
 0x247   : > { %v845_v8 = vpop.permute.xlu0 %844  ;;  %v1267_v49 = vmul.f32 %v3436_v39, %v882_v25  ;;  %v1504_v34 = vmul.f32 %v3389_v44, %v882_v25  ;;  %v1260_v17 = vadd.f32 %v1256_v47, %v1248_v26  ;;  %v1511_v16 = vmul.f32 %v3396_v20, %v882_v25 }
 0x248   : > { %v1278_v58 = vmul.f32 0.70710677, %v3457_v38  ;;  %2009 = verf.f32 %v1277_v29  ;;  %v1514_v43 = vadd.f32 %v1510_v53, %v1506_v1  ;;  %v1518_v11 = vmul.f32 %v3408_v61, %v882_v25 }
 0x249   : > { %v3465_v2 = vadd.f32 %v1267_v49, %v1259_v6  ;;  %v1508_v21 = vadd.f32 %v1504_v34, %v1491_v4  ;;  %v1512_v40 = vmul.f32 %v3396_v20, %v883_v62  ;;  %v1272_v46 = vadd.f32 %v1268_v28, %v1260_v17 }
 0x24a   : > { %v871_v18 = vpop.permute.xlu1 %870  ;;  %2011 = verf.f32 %v1278_v58  ;;  %v1515_v52 = vadd.f32 %v1511_v16, %v1507_v14  ;;  %v884_v55 = vsel %vm558_vm0, %v845_v8, %v869_v12  ;;  %v1505_v36 = vmul.f32 %v3389_v44, %v883_v62 }
 0x24b   : > { %v847_v51 = vpop.permute.xlu0 %846  ;;  %v1519_v30 = vmul.f32 %v3408_v61, %v883_v62  ;;  %v1279_v41 = vmul.f32 0.70710677, %v3465_v2  ;;  %v1522_v32 = vadd.f32 %v1518_v11, %v1514_v43  ;;  %v1526_v10 = vmul.f32 %v3416_v45, %v883_v62 }
 0x24c   : > { %v1280_v5 = vmul.f32 0.70710677, %v1272_v46  ;;  %v1516_v50 = vadd.f32 %v1512_v40, %v1508_v21  ;;  %v1520_v4 = vmul.f32 %v3408_v61, %v884_v55  ;;  %v1513_v33 = vmul.f32 %v3396_v20, %v884_v55 }
 0x24d   : > { %2013 = verf.f32 %v1279_v41  ;;  %v1523_v31 = vadd.f32 %v1519_v30, %v1515_v52  ;;  %v1527_v63 = vmul.f32 %v3416_v45, %v884_v55  ;;  %v1530_v44 = vadd.f32 %v1526_v10, %v1522_v32 }
 0x24e   : > { %v873_v7 = vpop.permute.xlu1 %872  ;;  %2015 = verf.f32 %v1280_v5  ;;  %v1534_v23 = vmul.f32 %v3436_v39, %v884_v55  ;;  %v1509_v15 = vadd.f32 %v1505_v36, %v1492_v3  ;;  %v1524_v24 = vadd.f32 %v1520_v4, %v1516_v50 }
 0x24f   : > { %v849_v0 = vpop.permute.xlu0 %848  ;;  %v885_v56 = vsel %vm558_vm0, %v847_v51, %v871_v18  ;;  %v1531_v59 = vadd.f32 %v1527_v63, %v1523_v31  ;;  %v1273_v35 = vmul.f32 0.5, %v1269_v48  ;;  %v1274_v8 = vmul.f32 0.5, %v3457_v38 }
 0x250   : > { %v886_v9 = vsel %vm558_vm0, %v849_v0, %v873_v7  ;;  %v1538_v13 = vadd.f32 %v1534_v23, %v1530_v44  ;;  %v1521_v19 = vmul.f32 %v3408_v61, %v885_v56  ;;  %v1528_v20 = vmul.f32 %v3416_v45, %v885_v56 }
 0x251   : > { %v1535_v57 = vmul.f32 %v3436_v39, %v885_v56  ;;  %v1517_v27 = vadd.f32 %v1513_v33, %v1509_v15  ;;  %v1529_v54 = vmul.f32 %v3416_v45, %v886_v9  ;;  %v1536_v37 = vmul.f32 %v3436_v39, %v886_v9 }
 0x252   : > { %v875_v22 = vpop.permute.xlu1 %874  ;;  %v2010_v25 = vpop.eup %2009  ;;  %v1546_v1 = vmul.f32 0.70710677, %v1538_v13  ;;  %v1532_v62 = vadd.f32 %v1528_v20, %v1524_v24  ;;  %v1275_v38 = vmul.f32 0.5, %v3465_v2  ;;  %v1276_v16 = vmul.f32 0.5, %v1272_v46 }
 0x253   : > { %v851_v42 = vpop.permute.xlu0 %850  ;;  %v1285_v3 = vadd.f32 1.0, %v2010_v25  ;;  %v1525_v61 = vadd.f32 %v1521_v19, %v1517_v27  ;;  %v1539_v53 = vadd.f32 %v1535_v57, %v1531_v59  ;;  %v1542_v51 = vmul.f32 0.5, %v1538_v13 }
 0x254   : > { %v2012_v12 = vpop.eup %2011  ;;  %v887_v26 = vsel %vm558_vm0, %v851_v42, %v875_v22  ;;  %2017 = verf.f32 %v1546_v1  ;;  %v1540_v45 = vadd.f32 %v1536_v37, %v1532_v62 }
 0x255   : > { %v1286_v14 = vadd.f32 1.0, %v2012_v12  ;;  %v1289_v29 = vmul.f32 %v1285_v3, %v1273_v35  ;;  %v1547_v47 = vmul.f32 0.70710677, %v1539_v53  ;;  %v1533_v6 = vadd.f32 %v1529_v54, %v1525_v61 }
 0x256   : > { %v1537_v48 = vmul.f32 %v3436_v39, %v887_v26  ;;  %v1548_v28 = vmul.f32 0.70710677, %v1540_v45  ;;  %v1543_v46 = vmul.f32 0.5, %v1539_v53  ;;  %v1544_v30 = vmul.f32 0.5, %v1540_v45 }
 0x257   : > { %v1290_v58 = vmul.f32 %v1286_v14, %v1274_v8  ;;  %v2014_v49 = vpop.eup %2013  ;;  %1293 = vst [vmem:[%s2750_s19] sm:$0xff] %v1289_v29  ;;  %2019 = verf.f32 %v1547_v47 }
 0x258   : > { %v1541_v60 = vadd.f32 %v1537_v48, %v1533_v6  ;;  %v2016_v34 = vpop.eup %2015  ;;  %v1287_v17 = vadd.f32 1.0, %v2014_v49  ;;  %2021 = verf.f32 %v1548_v28 }
 0x259   : > { %1294 = vst [vmem:[%s2750_s19 + $0x8] sm:$0xff] %v1290_v58  ;;  %v1288_v43 = vadd.f32 1.0, %v2016_v34 }
 0x25a   : > { %v1549_v18 = vmul.f32 0.70710677, %v1541_v60  ;;  %v1291_v39 = vmul.f32 %v1287_v17, %v1275_v38  ;;  %v1545_v50 = vmul.f32 0.5, %v1541_v60 }
 0x25b   : > { %v1292_v21 = vmul.f32 %v1288_v43, %v1276_v16 }
 0x25c   : > { %2023 = verf.f32 %v1549_v18  ;;  %1295 = vst [vmem:[%s2750_s19 + $0x10] sm:$0xff] %v1291_v39 }
 0x25d   : > { %1296 = vst [vmem:[%s2750_s19 + $0x18] sm:$0xff] %v1292_v21 }
 0x25e   : > { %v2018_v11 = vpop.eup %2017 }
 0x25f   : > { %v1554_v40 = vadd.f32 1.0, %v2018_v11 }
 0x261   : > { %v2020_v52 = vpop.eup %2019  ;;  %v1558_v2 = vmul.f32 %v1554_v40, %v1542_v51 }
 0x262   : > { %v2022_v55 = vpop.eup %2021  ;;  %v1555_v36 = vadd.f32 1.0, %v2020_v52 }
 0x263   : > { %1824 = vst [vmem:[%s2750_s19 + $0x20] sm:$0xff] %v1558_v2  ;;  %v1556_v41 = vadd.f32 1.0, %v2022_v55 }
 0x264   : > { %v1559_v32 = vmul.f32 %v1555_v36, %v1543_v46 }
 0x265   : > { %v1560_v5 = vmul.f32 %v1556_v41, %v1544_v30 }
 0x266   : > { %v2024_v10 = vpop.eup %2023  ;;  %1825 = vst [vmem:[%s2750_s19 + $0x28] sm:$0xff] %v1559_v32 }
 0x267   : > { %v1557_v4 = vadd.f32 1.0, %v2024_v10  ;;  %1826 = vst [vmem:[%s2750_s19 + $0x30] sm:$0xff] %v1560_v5 }
 0x269   : > { %v1561_v7 = vmul.f32 %v1557_v4, %v1545_v50 }
 0x26b   : > { %1827 = vst [vmem:[%s2750_s19 + $0x38] sm:$0xff] %v1561_v7 }
 0x26c   : > { %2156 = shalt.err (!%p2153_p3)
}
 0x26d   : > { %s2157_s19 = scalar_lea.hbm %s3508_s27, 1024  ;;  %s2161_s28 = scalar_lea.hbm %s3707_s4, 8192 }
 0x26e   : > { %p2158_p8 = scmp.ne.s32.totalorder %s3508_s27, %s2157_s19  ;;  %p2162_p1 = scmp.lt.u32.totalorder %s3508_s27, %s3707_s4 }
 0x26f   : > { %p2163_p13 = scmp.lt.u32.totalorder %s2161_s28, %s2157_s19  ;;  %p2165_p7 = scmp.lt.u32.totalorder %s2157_s19, %s3508_s27 }
 0x270   : > { %p2159_p9 = pnand %p2158_p8, %p3708_p6 }
 0x271   : > { %p2164_p10 = por %p2163_p13, %p2162_p1 }
 0x272   : > { %p2160_p4 = pneg %p2159_p9 }
 0x273   : > { %p2166_p5 = por %p2165_p7, %p2164_p10 }
 0x275   : > { %p2167_p2 = pnand %p2166_p5, %p2160_p4 }
 0x277   : > { %2170 = shalt.err (!%p2167_p2)
}
 0x278   : > { %s2316_s15 = smov 128   ;;  %s2317_s29 = smov 8  }
 0x279   : > { %1862 = dma.vmem_to_hbm [thread:$0]  (%p3708_p6), %s3503_s8, 1024, %s3508_s27, %s1568_s26, %s2316_s15, %s2316_s15, %s2317_s29  }
 0x27a PF: > { %s3709_s12 = sld [smem:[#allocation33_spill]]  ;;  %p1885_p0 = scmp.ge.s32.totalorder %s2301_s6, 2 }
 0x27b   : > { %s1598_s23 = sand.u32 1, %s2273_s24  }
 0x27c   : > { %s1599_s18 = scalar_lea.sflag [#allocation6], %s1598_s23 }
 0x280   : > { %p3710_p12 = scmp.ne.s32.totalorder %s3709_s12, 0 }
 0x282   : > { %p1879_p11 = pnand %p1885_p0, %p3710_p12 }
 0x284   : > { %2244 = dma.done.wait (!%p1879_p11), %s1599_s18, 1024  }
 0x285   : > { %2246 = vsyncadd (!%p1879_p11), %s1599_s18, 4294966272  ;;  %s25_s6 = sadd.s32 1, %s2301_s6   ;;  %s3712_s18 = sld [smem:[#allocation19_spill]] }
 0x286   : > { %p3540_p3 = scmp.ge.s32.totalorder %s25_s6, 10   ;;  %s3713_s19 = sld [smem:[#allocation20_spill]] }
 0x287   : > { %s3714_s17 = sld [smem:[#allocation21_spill]]  ;;  %s3715_s23 = sld [smem:[#allocation31_spill]] }
 0x288   : > { %s3716_s10 = sld [smem:[#allocation22_spill]]  ;;  %s3717_s26 = sld [smem:[#allocation32_spill]] }
 0x289   : > { %s3718_s27 = sld [smem:[#allocation25_spill]]  ;;  %s3719_s28 = sld [smem:[#allocation26_spill]] }
 0x28a   : > { %s3720_s29 = sld [smem:[#allocation27_spill]]  ;;  %s3721_s30 = sld [smem:[#allocation28_spill]] }
 0x28b   : > { %s3722_s20 = smov %s3742_s1  ;;  %s3723_s21 = smov %s2265_s22 }
 0x28c   : > { %s3725_s24 = smov %s2277_s25  ;;  %24 = sbr.rel (!%p3540_p3) target bundleno = 20 (0x14), region = 142 }
 0x28d   : > { %s3724_s22 = smov %s3714_s17 }
 0x28e   : > { %s3726_s25 = smov %s3716_s10 }
 0x293   :  { %1604 = vsyncpa [#allocation5], 1 }
 0x294   :  { %1606 = vsyncpa [#allocation5 + $0x1], 1 }
 0x295   :  { %1607 = vsyncpa [#allocation8], 1 }
 0x296   :  { %1609 = vsyncpa [#allocation8 + $0x1], 1 }
 0x297   :  { %1610 = vsyncpa [#allocation11], 1 }
 0x298   :  { %1611 = vsyncpa [#allocation6], 1 }
 0x299   :  { %1613 = vsyncpa [#allocation6 + $0x1], 1 }

</bundles_post_ra>
